<compile_context>
chip_gen: v7x
topology: tpu7x:2x2x1
jax: 0.10.0
libtpu: 0.0.40
codegen_flags: <defaults>
</compile_context>

<pallas_src>
import math
import numpy as np
import jax
import jax.numpy as jnp
from jax.experimental import pallas as pl
from jax.experimental.pallas import tpu as pltpu


def _pad8(v):
    return -(-v // 8) * 8


def _num_batch_blocks(B):
    """Grid steps along the batch: 2 on dual-TensorCore parts (v7x) so both
    cores get work; otherwise fold the whole batch into a single step."""
    try:
        kind = jax.devices()[0].device_kind.lower()
    except Exception:
        kind = ""
    if B >= 2 and B % 2 == 0 and ("v7" in kind or "7x" in kind):
        return 2
    return 1


def _build_fused_kernel(layer_meta, N, D, T_pad, Bt):
    """Fused SparseConv kernel for a block of Bt batch rows.

    Refs:
      x_ref    (Bt, D, N)        input rows, channels-first (native layout)
      w_ref    (sum K*D, D)      per-layer packed (K*D_in, D_out) weights
      b_ref    (n_layers, D)     packed biases
      oh_ref   (T_pad, N*N)      transposed one-hot placement (cell -> i*N+j)
      o_ref    (Bt, D, N*N)      channels-first flattened 2-D map (lane-dense)
      slab_ref (Bt*T_pad, D)     VMEM packed cells (diag + every layer output)
    """

    def kernel(x_ref, w_ref, b_ref, oh_ref, o_ref, slab_ref):
        # Zero the slab once: padded alignment rows must be finite zeros since
        # the placement matmul multiplies them by one-hot zeros (NaN*0 = NaN).
        slab_ref[...] = jnp.zeros_like(slab_ref)

        # Diagonal cells: in-kernel (D, N) -> (N, D) transpose (XLU slot is
        # otherwise idle), so the wrapper never transposes the input.
        for b in range(Bt):
            slab_ref[pl.ds(b * T_pad, N), :] = jnp.transpose(x_ref[b], (1, 0))

        # Conv chain, statically unrolled.  Each layer reads its input from
        # the previous layer's slab region; all K taps are fused into a single
        # MXU matmul via a lane-axis concat against the (K*D, D) weight block.
        for li, m in enumerate(layer_meta):
            K, S, L_out = m["K"], m["S"], m["L_out"]
            in_off, out_off, w_off = m["in_off"], m["out_off"], m["w_off"]
            w_l = w_ref[pl.ds(w_off, K * D), :]                      # (K*D, D)
            rows = []
            for b in range(Bt):
                base = b * T_pad + in_off
                if S == 1:
                    taps = [slab_ref[pl.ds(base + k, L_out), :] for k in range(K)]
                else:
                    # TODO(synk): confirm via pl.lower_as_mlir this strided
                    # sublane read stays a cheap strided load (not a gather).
                    taps = [slab_ref[pl.ds(base + k, L_out, stride=S), :]
                            for k in range(K)]
                rows.append(jnp.concatenate(taps, axis=1))           # (L_out, K*D)
            xcat = rows[0] if Bt == 1 else jnp.concatenate(rows, axis=0)
            out = jnp.dot(xcat, w_l, preferred_element_type=jnp.float32)
            out = out + b_ref[pl.ds(li, 1), :]                       # (Bt*L_out, D)
            for b in range(Bt):
                ob = out if Bt == 1 else out[b * L_out:(b + 1) * L_out, :]
                slab_ref[pl.ds(b * T_pad + out_off, L_out), :] = ob

        # Lane-dense channels-first placement: (D, T_pad) @ (T_pad, N*N).
        # Uncovered (i, j) positions stay exactly zero.
        for b in range(Bt):
            slab_b = slab_ref[pl.ds(b * T_pad, T_pad), :]            # (T_pad, D)
            res = jnp.dot(slab_b.T, oh_ref[...],
                          preferred_element_type=jnp.float32)        # (D, N*N)
            o_ref[b] = res.astype(o_ref.dtype)

    return kernel


class SparseConvPallas:
    """JAX/Pallas port of MTVG/mmn SparseConv (fused single-kernel forward)."""

    def __init__(self, pooling_counts, N, hidden_size, key):
        self.N = N
        self.hidden_size = hidden_size
        D = hidden_size

        # mask2d / maskij construction, exactly as in the PyTorch __init__.
        mask2d = np.zeros((N, N), dtype=bool)
        mask2d[np.arange(N), np.arange(N)] = True
        stride, offset = 1, 0
        maskij = []
        for c in pooling_counts:
            for _ in range(c):
                offset += stride
                i = np.arange(0, N - offset, stride)
                j = np.arange(offset, N, stride)
                mask2d[i, j] = True
                maskij.append((i, j))
            stride *= 2
        self.mask2d = mask2d          # kept for parity; unused in forward
        self.maskij = maskij

        # Conv layer specs, matching nn.ModuleList construction order.
        conv_specs = [(2, 1)] * pooling_counts[0]
        for c in pooling_counts[1:]:
            conv_specs += [(3, 2)] + [(2, 1)] * (c - 1)
        self.conv_specs = conv_specs

        # Deterministic parameter init (Conv1d-style U(-1/sqrt(fan_in*K), +)).
        # Weight stored as (K, D_in, D_out) == torch (D_out, D_in, K) transposed.
        self.params = []
        for (K, S) in conv_specs:
            key, kw, kb = jax.random.split(key, 3)
            bound = 1.0 / math.sqrt(D * K)
            w = jax.random.uniform(kw, (K, D, D), jnp.float32, -bound, bound)
            b = jax.random.uniform(kb, (D,), jnp.float32, -bound, bound)
            self.params.append((w, S, b))

        # Pack weights per layer as (K*D, D) row blocks (real K, no padding).
        w_blocks, w_offsets, off = [], [], 0
        for (w, _, _), (K, _) in zip(self.params, conv_specs):
            w_blocks.append(w.reshape(K * D, D))
            w_offsets.append(off)
            off += K * D
        self.w_packed = jnp.concatenate(w_blocks, axis=0)        # (sum K*D, D)
        self.b_packed = jnp.stack([b for (_, _, b) in self.params])  # (L, D)

        # Per-layer metadata with sublane-aligned (multiple-of-8) slab offsets.
        layer_meta = []
        cur, in_off, out_off = N, 0, _pad8(N)
        for li, ((K, S), (ii, jj)) in enumerate(zip(conv_specs, maskij)):
            L_out = (cur - K) // S + 1
            assert L_out == len(ii) == len(jj), (L_out, len(ii), len(jj))
            layer_meta.append(dict(K=K, S=S, L_out=L_out, in_off=in_off,
                                   out_off=out_off, w_off=w_offsets[li]))
            in_off = out_off
            out_off += _pad8(L_out)
            cur = L_out
        self.layer_meta = layer_meta
        self.T_pad = out_off

        # Transposed one-hot placement (T_pad, N*N); padded slots are all-zero
        # rows and therefore contribute nothing to the placement matmul.
        ohT = np.zeros((self.T_pad, N * N), np.float32)
        diag = np.arange(N)
        ohT[diag, diag * N + diag] = 1.0
        for m, (ii, jj) in zip(layer_meta, maskij):
            o = m["out_off"]
            ohT[o + np.arange(len(ii)), np.asarray(ii) * N + np.asarray(jj)] = 1.0
        self.ohT = jnp.asarray(ohT)                              # (T_pad, N*N)

        self._forward = jax.jit(self._forward_impl)

    def _forward_impl(self, x):
        B, D, N = x.shape
        NN = N * N
        G = _num_batch_blocks(B)
        if B % G != 0:
            G = 1
        Bt = B // G
        kernel = _build_fused_kernel(self.layer_meta, N, D, self.T_pad, Bt)

        n_layers = self.b_packed.shape[0]
        w_rows = self.w_packed.shape[0]
        T_pad = self.T_pad
        flops = 2 * B * (sum(m["K"] * D * D * m["L_out"] for m in self.layer_meta)
                         + D * T_pad * NN)
        bytes_accessed = 4 * (x.size + self.w_packed.size + self.b_packed.size
                              + self.ohT.size + B * D * NN)

        res = pl.pallas_call(
            kernel,
            out_shape=jax.ShapeDtypeStruct((B, D, NN), x.dtype),
            grid_spec=pltpu.PrefetchScalarGridSpec(
                num_scalar_prefetch=0,
                grid=(G,),
                in_specs=[
                    pl.BlockSpec((Bt, D, N), lambda g: (g, 0, 0)),
                    pl.BlockSpec((w_rows, D), lambda g: (0, 0)),
                    pl.BlockSpec((n_layers, D), lambda g: (0, 0)),
                    pl.BlockSpec((T_pad, NN), lambda g: (0, 0)),
                ],
                out_specs=pl.BlockSpec((Bt, D, NN), lambda g: (g, 0, 0)),
                scratch_shapes=[
                    pltpu.VMEM((Bt * T_pad, D), jnp.float32),   # packed cell slab
                ],
            ),
            compiler_params=pltpu.CompilerParams(
                dimension_semantics=("parallel",)),
            cost_estimate=pl.CostEstimate(flops=flops, transcendentals=0,
                                          bytes_accessed=bytes_accessed),
        )(x, self.w_packed, self.b_packed, self.ohT)
        # (B, D, N*N) -> (B, D, N, N): pure reshape, output is already
        # channels-first / lane-dense.
        return res.reshape(B, D, N, N)

    def __call__(self, x):
        """x: (B, D, N) as in PyTorch NCW.  Returns (B, D, N, N)."""
        return self._forward(x)

    def reference(self, x):
        """Pure-JAX reference (lax.conv + scatters) for correctness checking."""
        B, D, N = x.shape
        map2d = jnp.zeros((B, D, N, N), x.dtype)
        diag = np.arange(N)
        map2d = map2d.at[:, :, diag, diag].set(x)
        cur = x
        for (w, S, b), (i, j) in zip(self.params, self.maskij):
            w_oiw = jnp.transpose(w, (2, 1, 0))              # (D_out, D_in, K)
            cur = jax.lax.conv_general_dilated(
                cur, w_oiw, window_strides=(S,), padding="VALID",
                dimension_numbers=("NCH", "OIH", "NCH"))
            cur = cur + b[None, :, None]
            map2d = map2d.at[:, :, i, j].set(cur)
        return map2d


if __name__ == "__main__":
    B, hidden_size, N = 2, 32, 16
    pooling_counts = [7, 4]  # 7 x (k=2,s=1), then (k=3,s=2) + 3 x (k=2,s=1)

    key = jax.random.PRNGKey(0)
    kparam, kx = jax.random.split(key)
    model = SparseConvPallas(pooling_counts, N, hidden_size, kparam)
    x = jax.random.normal(kx, (B, hidden_size, N), jnp.float32)

    out = jax.block_until_ready(model(x))

    ref = jax.block_until_ready(model.reference(x))
    np.testing.assert_allclose(np.asarray(out), np.asarray(ref),
                               rtol=1e-4, atol=1e-4)
    print("KERNEL_OK")
</pallas_src>

<mosaic_0001>
module attributes {stable_mosaic.version = 11 : i64} {
  func.func @kernel(%arg0: i32, %arg1: memref<2x32x16xf32, #tpu.memory_space<vmem>>, %arg2: memref<736x32xf32, #tpu.memory_space<vmem>>, %arg3: memref<11x32xf32, #tpu.memory_space<vmem>>, %arg4: memref<160x256xf32, #tpu.memory_space<vmem>>, %arg5: memref<2x32x256xf32, #tpu.memory_space<vmem>>, %arg6: memref<320x32xf32, #tpu.memory_space<vmem>>) attributes {dimension_semantics = [#tpu.dimension_semantics<parallel>], iteration_bounds = array<i64: 1>, scalar_prefetch = 0 : i64, scratch_operands = 1 : i64, tpu.core_type = #tpu.core_type<tc>, window_params = [{transform_indices = @transform_0, window_bounds = array<i64: 2, 32, 16>}, {pipeline_mode = #tpu.pipeline_mode<synchronous>, transform_indices = @transform_1, window_bounds = array<i64: 736, 32>}, {pipeline_mode = #tpu.pipeline_mode<synchronous>, transform_indices = @transform_2, window_bounds = array<i64: 11, 32>}, {pipeline_mode = #tpu.pipeline_mode<synchronous>, transform_indices = @transform_3, window_bounds = array<i64: 160, 256>}, {transform_indices = @transform_4, window_bounds = array<i64: 2, 32, 256>}]} {
    %cst = arith.constant 0.000000e+00 : f32
    %0 = vector.broadcast %cst : f32 to vector<320x32xf32>
    %c0 = arith.constant 0 : index
    %c0_0 = arith.constant 0 : index
    %1 = vector.load %arg6[%c0, %c0_0] : memref<320x32xf32, #tpu.memory_space<vmem>>, vector<320x32xf32>
    tpu.vector_store %arg6[%c0, %c0_0], %0 {strides = array<i32>} : memref<320x32xf32, #tpu.memory_space<vmem>>, vector<320x32xf32>,
    %c0_1 = arith.constant 0 : index
    %c0_2 = arith.constant 0 : index
    %c0_3 = arith.constant 0 : index
    %2 = vector.load %arg1[%c0_1, %c0_2, %c0_3] : memref<2x32x16xf32, #tpu.memory_space<vmem>>, vector<1x32x16xf32>
    %3 = vector.shape_cast %2 : vector<1x32x16xf32> to vector<32x16xf32>
    %4 = tpu.transpose %3, [1, 0] : vector<32x16xf32> -> vector<16x32xf32>
    %c0_4 = arith.constant 0 : index
    %c0_5 = arith.constant 0 : index
    %5 = vector.load %arg6[%c0_4, %c0_5] : memref<320x32xf32, #tpu.memory_space<vmem>>, vector<16x32xf32>
    tpu.vector_store %arg6[%c0_4, %c0_5], %4 {strides = array<i32>} : memref<320x32xf32, #tpu.memory_space<vmem>>, vector<16x32xf32>,
    %c1 = arith.constant 1 : index
    %c0_6 = arith.constant 0 : index
    %c0_7 = arith.constant 0 : index
    %6 = vector.load %arg1[%c1, %c0_6, %c0_7] : memref<2x32x16xf32, #tpu.memory_space<vmem>>, vector<1x32x16xf32>
    %7 = vector.shape_cast %6 : vector<1x32x16xf32> to vector<32x16xf32>
    %8 = tpu.transpose %7, [1, 0] : vector<32x16xf32> -> vector<16x32xf32>
    %c160 = arith.constant 160 : index
    %c0_8 = arith.constant 0 : index
    %9 = vector.load %arg6[%c160, %c0_8] : memref<320x32xf32, #tpu.memory_space<vmem>>, vector<16x32xf32>
    tpu.vector_store %arg6[%c160, %c0_8], %8 {strides = array<i32>} : memref<320x32xf32, #tpu.memory_space<vmem>>, vector<16x32xf32>,
    %c0_9 = arith.constant 0 : index
    %c0_10 = arith.constant 0 : index
    %10 = vector.load %arg2[%c0_9, %c0_10] : memref<736x32xf32, #tpu.memory_space<vmem>>, vector<64x32xf32>
    %c0_11 = arith.constant 0 : index
    %c0_12 = arith.constant 0 : index
    %11 = vector.load %arg6[%c0_11, %c0_12] : memref<320x32xf32, #tpu.memory_space<vmem>>, vector<15x32xf32>
    %c1_13 = arith.constant 1 : index
    %c0_14 = arith.constant 0 : index
    %12 = vector.load %arg6[%c1_13, %c0_14] : memref<320x32xf32, #tpu.memory_space<vmem>>, vector<15x32xf32>
    %13 = tpu.concatenate %11, %12 in 1 : vector<15x32xf32>, vector<15x32xf32> -> vector<15x64xf32>
    %c160_15 = arith.constant 160 : index
    %c0_16 = arith.constant 0 : index
    %14 = vector.load %arg6[%c160_15, %c0_16] : memref<320x32xf32, #tpu.memory_space<vmem>>, vector<15x32xf32>
    %c161 = arith.constant 161 : index
    %c0_17 = arith.constant 0 : index
    %15 = vector.load %arg6[%c161, %c0_17] : memref<320x32xf32, #tpu.memory_space<vmem>>, vector<15x32xf32>
    %16 = tpu.concatenate %14, %15 in 1 : vector<15x32xf32>, vector<15x32xf32> -> vector<15x64xf32>
    %17 = tpu.concatenate %13, %16 in 0 : vector<15x64xf32>, vector<15x64xf32> -> vector<30x64xf32>
    %cst_18 = arith.constant dense<0.000000e+00> : vector<30x32xf32>
    %18 = tpu.matmul %17, %10, %cst_18 {dimension_numbers = #tpu.dot_dimension_numbers<[1], [0], [0], [1], [0, 0, 1, 1], [], []>} : vector<30x64xf32>, vector<64x32xf32>, vector<30x32xf32> -> vector<30x32xf32>
    %c0_19 = arith.constant 0 : index
    %c0_20 = arith.constant 0 : index
    %19 = vector.load %arg3[%c0_19, %c0_20] : memref<11x32xf32, #tpu.memory_space<vmem>>, vector<1x32xf32>
    %20 = vector.broadcast %19 : vector<1x32xf32> to vector<30x32xf32>
    %21 = arith.addf %18, %20 : vector<30x32xf32>
    %22 = vector.extract_strided_slice %21 {offsets = [0, 0], sizes = [15, 32], strides = [1, 1]} : vector<30x32xf32> to vector<15x32xf32>
    %c16 = arith.constant 16 : index
    %c0_21 = arith.constant 0 : index
    %23 = vector.load %arg6[%c16, %c0_21] : memref<320x32xf32, #tpu.memory_space<vmem>>, vector<15x32xf32>
    tpu.vector_store %arg6[%c16, %c0_21], %22 {strides = array<i32>} : memref<320x32xf32, #tpu.memory_space<vmem>>, vector<15x32xf32>,
    %24 = vector.extract_strided_slice %21 {offsets = [15, 0], sizes = [15, 32], strides = [1, 1]} : vector<30x32xf32> to vector<15x32xf32>
    %c176 = arith.constant 176 : index
    %c0_22 = arith.constant 0 : index
    %25 = vector.load %arg6[%c176, %c0_22] : memref<320x32xf32, #tpu.memory_space<vmem>>, vector<15x32xf32>
    tpu.vector_store %arg6[%c176, %c0_22], %24 {strides = array<i32>} : memref<320x32xf32, #tpu.memory_space<vmem>>, vector<15x32xf32>,
    %c64 = arith.constant 64 : index
    %c0_23 = arith.constant 0 : index
    %26 = vector.load %arg2[%c64, %c0_23] : memref<736x32xf32, #tpu.memory_space<vmem>>, vector<64x32xf32>
    %c16_24 = arith.constant 16 : index
    %c0_25 = arith.constant 0 : index
    %27 = vector.load %arg6[%c16_24, %c0_25] : memref<320x32xf32, #tpu.memory_space<vmem>>, vector<14x32xf32>
    %c17 = arith.constant 17 : index
    %c0_26 = arith.constant 0 : index
    %28 = vector.load %arg6[%c17, %c0_26] : memref<320x32xf32, #tpu.memory_space<vmem>>, vector<14x32xf32>
    %29 = tpu.concatenate %27, %28 in 1 : vector<14x32xf32>, vector<14x32xf32> -> vector<14x64xf32>
    %c176_27 = arith.constant 176 : index
    %c0_28 = arith.constant 0 : index
    %30 = vector.load %arg6[%c176_27, %c0_28] : memref<320x32xf32, #tpu.memory_space<vmem>>, vector<14x32xf32>
    %c177 = arith.constant 177 : index
    %c0_29 = arith.constant 0 : index
    %31 = vector.load %arg6[%c177, %c0_29] : memref<320x32xf32, #tpu.memory_space<vmem>>, vector<14x32xf32>
    %32 = tpu.concatenate %30, %31 in 1 : vector<14x32xf32>, vector<14x32xf32> -> vector<14x64xf32>
    %33 = tpu.concatenate %29, %32 in 0 : vector<14x64xf32>, vector<14x64xf32> -> vector<28x64xf32>
    %cst_30 = arith.constant dense<0.000000e+00> : vector<28x32xf32>
    %34 = tpu.matmul %33, %26, %cst_30 {dimension_numbers = #tpu.dot_dimension_numbers<[1], [0], [0], [1], [0, 0, 1, 1], [], []>} : vector<28x64xf32>, vector<64x32xf32>, vector<28x32xf32> -> vector<28x32xf32>
    %c1_31 = arith.constant 1 : index
    %c0_32 = arith.constant 0 : index
    %35 = vector.load %arg3[%c1_31, %c0_32] : memref<11x32xf32, #tpu.memory_space<vmem>>, vector<1x32xf32>
    %36 = vector.broadcast %35 : vector<1x32xf32> to vector<28x32xf32>
    %37 = arith.addf %34, %36 : vector<28x32xf32>
    %38 = vector.extract_strided_slice %37 {offsets = [0, 0], sizes = [14, 32], strides = [1, 1]} : vector<28x32xf32> to vector<14x32xf32>
    %c32 = arith.constant 32 : index
    %c0_33 = arith.constant 0 : index
    %39 = vector.load %arg6[%c32, %c0_33] : memref<320x32xf32, #tpu.memory_space<vmem>>, vector<14x32xf32>
    tpu.vector_store %arg6[%c32, %c0_33], %38 {strides = array<i32>} : memref<320x32xf32, #tpu.memory_space<vmem>>, vector<14x32xf32>,
    %40 = vector.extract_strided_slice %37 {offsets = [14, 0], sizes = [14, 32], strides = [1, 1]} : vector<28x32xf32> to vector<14x32xf32>
    %c192 = arith.constant 192 : index
    %c0_34 = arith.constant 0 : index
    %41 = vector.load %arg6[%c192, %c0_34] : memref<320x32xf32, #tpu.memory_space<vmem>>, vector<14x32xf32>
    tpu.vector_store %arg6[%c192, %c0_34], %40 {strides = array<i32>} : memref<320x32xf32, #tpu.memory_space<vmem>>, vector<14x32xf32>,
    %c128 = arith.constant 128 : index
    %c0_35 = arith.constant 0 : index
    %42 = vector.load %arg2[%c128, %c0_35] : memref<736x32xf32, #tpu.memory_space<vmem>>, vector<64x32xf32>
    %c32_36 = arith.constant 32 : index
    %c0_37 = arith.constant 0 : index
    %43 = vector.load %arg6[%c32_36, %c0_37] : memref<320x32xf32, #tpu.memory_space<vmem>>, vector<13x32xf32>
    %c33 = arith.constant 33 : index
    %c0_38 = arith.constant 0 : index
    %44 = vector.load %arg6[%c33, %c0_38] : memref<320x32xf32, #tpu.memory_space<vmem>>, vector<13x32xf32>
    %45 = tpu.concatenate %43, %44 in 1 : vector<13x32xf32>, vector<13x32xf32> -> vector<13x64xf32>
    %c192_39 = arith.constant 192 : index
    %c0_40 = arith.constant 0 : index
    %46 = vector.load %arg6[%c192_39, %c0_40] : memref<320x32xf32, #tpu.memory_space<vmem>>, vector<13x32xf32>
    %c193 = arith.constant 193 : index
    %c0_41 = arith.constant 0 : index
    %47 = vector.load %arg6[%c193, %c0_41] : memref<320x32xf32, #tpu.memory_space<vmem>>, vector<13x32xf32>
    %48 = tpu.concatenate %46, %47 in 1 : vector<13x32xf32>, vector<13x32xf32> -> vector<13x64xf32>
    %49 = tpu.concatenate %45, %48 in 0 : vector<13x64xf32>, vector<13x64xf32> -> vector<26x64xf32>
    %cst_42 = arith.constant dense<0.000000e+00> : vector<26x32xf32>
    %50 = tpu.matmul %49, %42, %cst_42 {dimension_numbers = #tpu.dot_dimension_numbers<[1], [0], [0], [1], [0, 0, 1, 1], [], []>} : vector<26x64xf32>, vector<64x32xf32>, vector<26x32xf32> -> vector<26x32xf32>
    %c2 = arith.constant 2 : index
    %c0_43 = arith.constant 0 : index
    %51 = vector.load %arg3[%c2, %c0_43] : memref<11x32xf32, #tpu.memory_space<vmem>>, vector<1x32xf32>
    %52 = vector.broadcast %51 : vector<1x32xf32> to vector<26x32xf32>
    %53 = arith.addf %50, %52 : vector<26x32xf32>
    %54 = vector.extract_strided_slice %53 {offsets = [0, 0], sizes = [13, 32], strides = [1, 1]} : vector<26x32xf32> to vector<13x32xf32>
    %c48 = arith.constant 48 : index
    %c0_44 = arith.constant 0 : index
    %55 = vector.load %arg6[%c48, %c0_44] : memref<320x32xf32, #tpu.memory_space<vmem>>, vector<13x32xf32>
    tpu.vector_store %arg6[%c48, %c0_44], %54 {strides = array<i32>} : memref<320x32xf32, #tpu.memory_space<vmem>>, vector<13x32xf32>,
    %56 = vector.extract_strided_slice %53 {offsets = [13, 0], sizes = [13, 32], strides = [1, 1]} : vector<26x32xf32> to vector<13x32xf32>
    %c208 = arith.constant 208 : index
    %c0_45 = arith.constant 0 : index
    %57 = vector.load %arg6[%c208, %c0_45] : memref<320x32xf32, #tpu.memory_space<vmem>>, vector<13x32xf32>
    tpu.vector_store %arg6[%c208, %c0_45], %56 {strides = array<i32>} : memref<320x32xf32, #tpu.memory_space<vmem>>, vector<13x32xf32>,
    %c192_46 = arith.constant 192 : index
    %c0_47 = arith.constant 0 : index
    %58 = vector.load %arg2[%c192_46, %c0_47] : memref<736x32xf32, #tpu.memory_space<vmem>>, vector<64x32xf32>
    %c48_48 = arith.constant 48 : index
    %c0_49 = arith.constant 0 : index
    %59 = vector.load %arg6[%c48_48, %c0_49] : memref<320x32xf32, #tpu.memory_space<vmem>>, vector<12x32xf32>
    %c49 = arith.constant 49 : index
    %c0_50 = arith.constant 0 : index
    %60 = vector.load %arg6[%c49, %c0_50] : memref<320x32xf32, #tpu.memory_space<vmem>>, vector<12x32xf32>
    %61 = tpu.concatenate %59, %60 in 1 : vector<12x32xf32>, vector<12x32xf32> -> vector<12x64xf32>
    %c208_51 = arith.constant 208 : index
    %c0_52 = arith.constant 0 : index
    %62 = vector.load %arg6[%c208_51, %c0_52] : memref<320x32xf32, #tpu.memory_space<vmem>>, vector<12x32xf32>
    %c209 = arith.constant 209 : index
    %c0_53 = arith.constant 0 : index
    %63 = vector.load %arg6[%c209, %c0_53] : memref<320x32xf32, #tpu.memory_space<vmem>>, vector<12x32xf32>
    %64 = tpu.concatenate %62, %63 in 1 : vector<12x32xf32>, vector<12x32xf32> -> vector<12x64xf32>
    %65 = tpu.concatenate %61, %64 in 0 : vector<12x64xf32>, vector<12x64xf32> -> vector<24x64xf32>
    %cst_54 = arith.constant dense<0.000000e+00> : vector<24x32xf32>
    %66 = tpu.matmul %65, %58, %cst_54 {dimension_numbers = #tpu.dot_dimension_numbers<[1], [0], [0], [1], [0, 0, 1, 1], [], []>} : vector<24x64xf32>, vector<64x32xf32>, vector<24x32xf32> -> vector<24x32xf32>
    %c3 = arith.constant 3 : index
    %c0_55 = arith.constant 0 : index
    %67 = vector.load %arg3[%c3, %c0_55] : memref<11x32xf32, #tpu.memory_space<vmem>>, vector<1x32xf32>
    %68 = vector.broadcast %67 : vector<1x32xf32> to vector<24x32xf32>
    %69 = arith.addf %66, %68 : vector<24x32xf32>
    %70 = vector.extract_strided_slice %69 {offsets = [0, 0], sizes = [12, 32], strides = [1, 1]} : vector<24x32xf32> to vector<12x32xf32>
    %c64_56 = arith.constant 64 : index
    %c0_57 = arith.constant 0 : index
    %71 = vector.load %arg6[%c64_56, %c0_57] : memref<320x32xf32, #tpu.memory_space<vmem>>, vector<12x32xf32>
    tpu.vector_store %arg6[%c64_56, %c0_57], %70 {strides = array<i32>} : memref<320x32xf32, #tpu.memory_space<vmem>>, vector<12x32xf32>,
    %72 = vector.extract_strided_slice %69 {offsets = [12, 0], sizes = [12, 32], strides = [1, 1]} : vector<24x32xf32> to vector<12x32xf32>
    %c224 = arith.constant 224 : index
    %c0_58 = arith.constant 0 : index
    %73 = vector.load %arg6[%c224, %c0_58] : memref<320x32xf32, #tpu.memory_space<vmem>>, vector<12x32xf32>
    tpu.vector_store %arg6[%c224, %c0_58], %72 {strides = array<i32>} : memref<320x32xf32, #tpu.memory_space<vmem>>, vector<12x32xf32>,
    %c256 = arith.constant 256 : index
    %c0_59 = arith.constant 0 : index
    %74 = vector.load %arg2[%c256, %c0_59] : memref<736x32xf32, #tpu.memory_space<vmem>>, vector<64x32xf32>
    %c64_60 = arith.constant 64 : index
    %c0_61 = arith.constant 0 : index
    %75 = vector.load %arg6[%c64_60, %c0_61] : memref<320x32xf32, #tpu.memory_space<vmem>>, vector<11x32xf32>
    %c65 = arith.constant 65 : index
    %c0_62 = arith.constant 0 : index
    %76 = vector.load %arg6[%c65, %c0_62] : memref<320x32xf32, #tpu.memory_space<vmem>>, vector<11x32xf32>
    %77 = tpu.concatenate %75, %76 in 1 : vector<11x32xf32>, vector<11x32xf32> -> vector<11x64xf32>
    %c224_63 = arith.constant 224 : index
    %c0_64 = arith.constant 0 : index
    %78 = vector.load %arg6[%c224_63, %c0_64] : memref<320x32xf32, #tpu.memory_space<vmem>>, vector<11x32xf32>
    %c225 = arith.constant 225 : index
    %c0_65 = arith.constant 0 : index
    %79 = vector.load %arg6[%c225, %c0_65] : memref<320x32xf32, #tpu.memory_space<vmem>>, vector<11x32xf32>
    %80 = tpu.concatenate %78, %79 in 1 : vector<11x32xf32>, vector<11x32xf32> -> vector<11x64xf32>
    %81 = tpu.concatenate %77, %80 in 0 : vector<11x64xf32>, vector<11x64xf32> -> vector<22x64xf32>
    %cst_66 = arith.constant dense<0.000000e+00> : vector<22x32xf32>
    %82 = tpu.matmul %81, %74, %cst_66 {dimension_numbers = #tpu.dot_dimension_numbers<[1], [0], [0], [1], [0, 0, 1, 1], [], []>} : vector<22x64xf32>, vector<64x32xf32>, vector<22x32xf32> -> vector<22x32xf32>
    %c4 = arith.constant 4 : index
    %c0_67 = arith.constant 0 : index
    %83 = vector.load %arg3[%c4, %c0_67] : memref<11x32xf32, #tpu.memory_space<vmem>>, vector<1x32xf32>
    %84 = vector.broadcast %83 : vector<1x32xf32> to vector<22x32xf32>
    %85 = arith.addf %82, %84 : vector<22x32xf32>
    %86 = vector.extract_strided_slice %85 {offsets = [0, 0], sizes = [11, 32], strides = [1, 1]} : vector<22x32xf32> to vector<11x32xf32>
    %c80 = arith.constant 80 : index
    %c0_68 = arith.constant 0 : index
    %87 = vector.load %arg6[%c80, %c0_68] : memref<320x32xf32, #tpu.memory_space<vmem>>, vector<11x32xf32>
    tpu.vector_store %arg6[%c80, %c0_68], %86 {strides = array<i32>} : memref<320x32xf32, #tpu.memory_space<vmem>>, vector<11x32xf32>,
    %88 = vector.extract_strided_slice %85 {offsets = [11, 0], sizes = [11, 32], strides = [1, 1]} : vector<22x32xf32> to vector<11x32xf32>
    %c240 = arith.constant 240 : index
    %c0_69 = arith.constant 0 : index
    %89 = vector.load %arg6[%c240, %c0_69] : memref<320x32xf32, #tpu.memory_space<vmem>>, vector<11x32xf32>
    tpu.vector_store %arg6[%c240, %c0_69], %88 {strides = array<i32>} : memref<320x32xf32, #tpu.memory_space<vmem>>, vector<11x32xf32>,
    %c320 = arith.constant 320 : index
    %c0_70 = arith.constant 0 : index
    %90 = vector.load %arg2[%c320, %c0_70] : memref<736x32xf32, #tpu.memory_space<vmem>>, vector<64x32xf32>
    %c80_71 = arith.constant 80 : index
    %c0_72 = arith.constant 0 : index
    %91 = vector.load %arg6[%c80_71, %c0_72] : memref<320x32xf32, #tpu.memory_space<vmem>>, vector<10x32xf32>
    %c81 = arith.constant 81 : index
    %c0_73 = arith.constant 0 : index
    %92 = vector.load %arg6[%c81, %c0_73] : memref<320x32xf32, #tpu.memory_space<vmem>>, vector<10x32xf32>
    %93 = tpu.concatenate %91, %92 in 1 : vector<10x32xf32>, vector<10x32xf32> -> vector<10x64xf32>
    %c240_74 = arith.constant 240 : index
    %c0_75 = arith.constant 0 : index
    %94 = vector.load %arg6[%c240_74, %c0_75] : memref<320x32xf32, #tpu.memory_space<vmem>>, vector<10x32xf32>
    %c241 = arith.constant 241 : index
    %c0_76 = arith.constant 0 : index
    %95 = vector.load %arg6[%c241, %c0_76] : memref<320x32xf32, #tpu.memory_space<vmem>>, vector<10x32xf32>
    %96 = tpu.concatenate %94, %95 in 1 : vector<10x32xf32>, vector<10x32xf32> -> vector<10x64xf32>
    %97 = tpu.concatenate %93, %96 in 0 : vector<10x64xf32>, vector<10x64xf32> -> vector<20x64xf32>
    %cst_77 = arith.constant dense<0.000000e+00> : vector<20x32xf32>
    %98 = tpu.matmul %97, %90, %cst_77 {dimension_numbers = #tpu.dot_dimension_numbers<[1], [0], [0], [1], [0, 0, 1, 1], [], []>} : vector<20x64xf32>, vector<64x32xf32>, vector<20x32xf32> -> vector<20x32xf32>
    %c5 = arith.constant 5 : index
    %c0_78 = arith.constant 0 : index
    %99 = vector.load %arg3[%c5, %c0_78] : memref<11x32xf32, #tpu.memory_space<vmem>>, vector<1x32xf32>
    %100 = vector.broadcast %99 : vector<1x32xf32> to vector<20x32xf32>
    %101 = arith.addf %98, %100 : vector<20x32xf32>
    %102 = vector.extract_strided_slice %101 {offsets = [0, 0], sizes = [10, 32], strides = [1, 1]} : vector<20x32xf32> to vector<10x32xf32>
    %c96 = arith.constant 96 : index
    %c0_79 = arith.constant 0 : index
    %103 = vector.load %arg6[%c96, %c0_79] : memref<320x32xf32, #tpu.memory_space<vmem>>, vector<10x32xf32>
    tpu.vector_store %arg6[%c96, %c0_79], %102 {strides = array<i32>} : memref<320x32xf32, #tpu.memory_space<vmem>>, vector<10x32xf32>,
    %104 = vector.extract_strided_slice %101 {offsets = [10, 0], sizes = [10, 32], strides = [1, 1]} : vector<20x32xf32> to vector<10x32xf32>
    %c256_80 = arith.constant 256 : index
    %c0_81 = arith.constant 0 : index
    %105 = vector.load %arg6[%c256_80, %c0_81] : memref<320x32xf32, #tpu.memory_space<vmem>>, vector<10x32xf32>
    tpu.vector_store %arg6[%c256_80, %c0_81], %104 {strides = array<i32>} : memref<320x32xf32, #tpu.memory_space<vmem>>, vector<10x32xf32>,
    %c384 = arith.constant 384 : index
    %c0_82 = arith.constant 0 : index
    %106 = vector.load %arg2[%c384, %c0_82] : memref<736x32xf32, #tpu.memory_space<vmem>>, vector<64x32xf32>
    %c96_83 = arith.constant 96 : index
    %c0_84 = arith.constant 0 : index
    %107 = vector.load %arg6[%c96_83, %c0_84] : memref<320x32xf32, #tpu.memory_space<vmem>>, vector<9x32xf32>
    %c97 = arith.constant 97 : index
    %c0_85 = arith.constant 0 : index
    %108 = vector.load %arg6[%c97, %c0_85] : memref<320x32xf32, #tpu.memory_space<vmem>>, vector<9x32xf32>
    %109 = tpu.concatenate %107, %108 in 1 : vector<9x32xf32>, vector<9x32xf32> -> vector<9x64xf32>
    %c256_86 = arith.constant 256 : index
    %c0_87 = arith.constant 0 : index
    %110 = vector.load %arg6[%c256_86, %c0_87] : memref<320x32xf32, #tpu.memory_space<vmem>>, vector<9x32xf32>
    %c257 = arith.constant 257 : index
    %c0_88 = arith.constant 0 : index
    %111 = vector.load %arg6[%c257, %c0_88] : memref<320x32xf32, #tpu.memory_space<vmem>>, vector<9x32xf32>
    %112 = tpu.concatenate %110, %111 in 1 : vector<9x32xf32>, vector<9x32xf32> -> vector<9x64xf32>
    %113 = tpu.concatenate %109, %112 in 0 : vector<9x64xf32>, vector<9x64xf32> -> vector<18x64xf32>
    %cst_89 = arith.constant dense<0.000000e+00> : vector<18x32xf32>
    %114 = tpu.matmul %113, %106, %cst_89 {dimension_numbers = #tpu.dot_dimension_numbers<[1], [0], [0], [1], [0, 0, 1, 1], [], []>} : vector<18x64xf32>, vector<64x32xf32>, vector<18x32xf32> -> vector<18x32xf32>
    %c6 = arith.constant 6 : index
    %c0_90 = arith.constant 0 : index
    %115 = vector.load %arg3[%c6, %c0_90] : memref<11x32xf32, #tpu.memory_space<vmem>>, vector<1x32xf32>
    %116 = vector.broadcast %115 : vector<1x32xf32> to vector<18x32xf32>
    %117 = arith.addf %114, %116 : vector<18x32xf32>
    %118 = vector.extract_strided_slice %117 {offsets = [0, 0], sizes = [9, 32], strides = [1, 1]} : vector<18x32xf32> to vector<9x32xf32>
    %c112 = arith.constant 112 : index
    %c0_91 = arith.constant 0 : index
    %119 = vector.load %arg6[%c112, %c0_91] : memref<320x32xf32, #tpu.memory_space<vmem>>, vector<9x32xf32>
    tpu.vector_store %arg6[%c112, %c0_91], %118 {strides = array<i32>} : memref<320x32xf32, #tpu.memory_space<vmem>>, vector<9x32xf32>,
    %120 = vector.extract_strided_slice %117 {offsets = [9, 0], sizes = [9, 32], strides = [1, 1]} : vector<18x32xf32> to vector<9x32xf32>
    %c272 = arith.constant 272 : index
    %c0_92 = arith.constant 0 : index
    %121 = vector.load %arg6[%c272, %c0_92] : memref<320x32xf32, #tpu.memory_space<vmem>>, vector<9x32xf32>
    tpu.vector_store %arg6[%c272, %c0_92], %120 {strides = array<i32>} : memref<320x32xf32, #tpu.memory_space<vmem>>, vector<9x32xf32>,
    %c448 = arith.constant 448 : index
    %c0_93 = arith.constant 0 : index
    %122 = vector.load %arg2[%c448, %c0_93] : memref<736x32xf32, #tpu.memory_space<vmem>>, vector<96x32xf32>
    %c112_94 = arith.constant 112 : index
    %c0_95 = arith.constant 0 : index
    %123 = tpu.strided_load %arg6[%c112_94, %c0_95] {strides = array<i32: 2, 1>} : memref<320x32xf32, #tpu.memory_space<vmem>>, vector<4x32xf32>
    %c113 = arith.constant 113 : index
    %c0_96 = arith.constant 0 : index
    %124 = tpu.strided_load %arg6[%c113, %c0_96] {strides = array<i32: 2, 1>} : memref<320x32xf32, #tpu.memory_space<vmem>>, vector<4x32xf32>
    %c114 = arith.constant 114 : index
    %c0_97 = arith.constant 0 : index
    %125 = tpu.strided_load %arg6[%c114, %c0_97] {strides = array<i32: 2, 1>} : memref<320x32xf32, #tpu.memory_space<vmem>>, vector<4x32xf32>
    %126 = tpu.concatenate %123, %124, %125 in 1 : vector<4x32xf32>, vector<4x32xf32>, vector<4x32xf32> -> vector<4x96xf32>
    %c272_98 = arith.constant 272 : index
    %c0_99 = arith.constant 0 : index
    %127 = tpu.strided_load %arg6[%c272_98, %c0_99] {strides = array<i32: 2, 1>} : memref<320x32xf32, #tpu.memory_space<vmem>>, vector<4x32xf32>
    %c273 = arith.constant 273 : index
    %c0_100 = arith.constant 0 : index
    %128 = tpu.strided_load %arg6[%c273, %c0_100] {strides = array<i32: 2, 1>} : memref<320x32xf32, #tpu.memory_space<vmem>>, vector<4x32xf32>
    %c274 = arith.constant 274 : index
    %c0_101 = arith.constant 0 : index
    %129 = tpu.strided_load %arg6[%c274, %c0_101] {strides = array<i32: 2, 1>} : memref<320x32xf32, #tpu.memory_space<vmem>>, vector<4x32xf32>
    %130 = tpu.concatenate %127, %128, %129 in 1 : vector<4x32xf32>, vector<4x32xf32>, vector<4x32xf32> -> vector<4x96xf32>
    %131 = tpu.concatenate %126, %130 in 0 : vector<4x96xf32>, vector<4x96xf32> -> vector<8x96xf32>
    %cst_102 = arith.constant dense<0.000000e+00> : vector<8x32xf32>
    %132 = tpu.matmul %131, %122, %cst_102 {dimension_numbers = #tpu.dot_dimension_numbers<[1], [0], [0], [1], [0, 0, 1, 1], [], []>} : vector<8x96xf32>, vector<96x32xf32>, vector<8x32xf32> -> vector<8x32xf32>
    %c7 = arith.constant 7 : index
    %c0_103 = arith.constant 0 : index
    %133 = vector.load %arg3[%c7, %c0_103] : memref<11x32xf32, #tpu.memory_space<vmem>>, vector<1x32xf32>
    %134 = vector.broadcast %133 : vector<1x32xf32> to vector<8x32xf32>
    %135 = arith.addf %132, %134 : vector<8x32xf32>
    %136 = vector.extract_strided_slice %135 {offsets = [0, 0], sizes = [4, 32], strides = [1, 1]} : vector<8x32xf32> to vector<4x32xf32>
    %c128_104 = arith.constant 128 : index
    %c0_105 = arith.constant 0 : index
    %137 = vector.load %arg6[%c128_104, %c0_105] : memref<320x32xf32, #tpu.memory_space<vmem>>, vector<4x32xf32>
    tpu.vector_store %arg6[%c128_104, %c0_105], %136 {strides = array<i32>} : memref<320x32xf32, #tpu.memory_space<vmem>>, vector<4x32xf32>,
    %138 = vector.extract_strided_slice %135 {offsets = [4, 0], sizes = [4, 32], strides = [1, 1]} : vector<8x32xf32> to vector<4x32xf32>
    %c288 = arith.constant 288 : index
    %c0_106 = arith.constant 0 : index
    %139 = vector.load %arg6[%c288, %c0_106] : memref<320x32xf32, #tpu.memory_space<vmem>>, vector<4x32xf32>
    tpu.vector_store %arg6[%c288, %c0_106], %138 {strides = array<i32>} : memref<320x32xf32, #tpu.memory_space<vmem>>, vector<4x32xf32>,
    %c544 = arith.constant 544 : index
    %c0_107 = arith.constant 0 : index
    %140 = vector.load %arg2[%c544, %c0_107] : memref<736x32xf32, #tpu.memory_space<vmem>>, vector<64x32xf32>
    %c128_108 = arith.constant 128 : index
    %c0_109 = arith.constant 0 : index
    %141 = vector.load %arg6[%c128_108, %c0_109] : memref<320x32xf32, #tpu.memory_space<vmem>>, vector<3x32xf32>
    %c129 = arith.constant 129 : index
    %c0_110 = arith.constant 0 : index
    %142 = vector.load %arg6[%c129, %c0_110] : memref<320x32xf32, #tpu.memory_space<vmem>>, vector<3x32xf32>
    %143 = tpu.concatenate %141, %142 in 1 : vector<3x32xf32>, vector<3x32xf32> -> vector<3x64xf32>
    %c288_111 = arith.constant 288 : index
    %c0_112 = arith.constant 0 : index
    %144 = vector.load %arg6[%c288_111, %c0_112] : memref<320x32xf32, #tpu.memory_space<vmem>>, vector<3x32xf32>
    %c289 = arith.constant 289 : index
    %c0_113 = arith.constant 0 : index
    %145 = vector.load %arg6[%c289, %c0_113] : memref<320x32xf32, #tpu.memory_space<vmem>>, vector<3x32xf32>
    %146 = tpu.concatenate %144, %145 in 1 : vector<3x32xf32>, vector<3x32xf32> -> vector<3x64xf32>
    %147 = tpu.concatenate %143, %146 in 0 : vector<3x64xf32>, vector<3x64xf32> -> vector<6x64xf32>
    %cst_114 = arith.constant dense<0.000000e+00> : vector<6x32xf32>
    %148 = tpu.matmul %147, %140, %cst_114 {dimension_numbers = #tpu.dot_dimension_numbers<[1], [0], [0], [1], [0, 0, 1, 1], [], []>} : vector<6x64xf32>, vector<64x32xf32>, vector<6x32xf32> -> vector<6x32xf32>
    %c8 = arith.constant 8 : index
    %c0_115 = arith.constant 0 : index
    %149 = vector.load %arg3[%c8, %c0_115] : memref<11x32xf32, #tpu.memory_space<vmem>>, vector<1x32xf32>
    %150 = vector.broadcast %149 : vector<1x32xf32> to vector<6x32xf32>
    %151 = arith.addf %148, %150 : vector<6x32xf32>
    %152 = vector.extract_strided_slice %151 {offsets = [0, 0], sizes = [3, 32], strides = [1, 1]} : vector<6x32xf32> to vector<3x32xf32>
    %c136 = arith.constant 136 : index
    %c0_116 = arith.constant 0 : index
    %153 = vector.load %arg6[%c136, %c0_116] : memref<320x32xf32, #tpu.memory_space<vmem>>, vector<3x32xf32>
    tpu.vector_store %arg6[%c136, %c0_116], %152 {strides = array<i32>} : memref<320x32xf32, #tpu.memory_space<vmem>>, vector<3x32xf32>,
    %154 = vector.extract_strided_slice %151 {offsets = [3, 0], sizes = [3, 32], strides = [1, 1]} : vector<6x32xf32> to vector<3x32xf32>
    %c296 = arith.constant 296 : index
    %c0_117 = arith.constant 0 : index
    %155 = vector.load %arg6[%c296, %c0_117] : memref<320x32xf32, #tpu.memory_space<vmem>>, vector<3x32xf32>
    tpu.vector_store %arg6[%c296, %c0_117], %154 {strides = array<i32>} : memref<320x32xf32, #tpu.memory_space<vmem>>, vector<3x32xf32>,
    %c608 = arith.constant 608 : index
    %c0_118 = arith.constant 0 : index
    %156 = vector.load %arg2[%c608, %c0_118] : memref<736x32xf32, #tpu.memory_space<vmem>>, vector<64x32xf32>
    %c136_119 = arith.constant 136 : index
    %c0_120 = arith.constant 0 : index
    %157 = vector.load %arg6[%c136_119, %c0_120] : memref<320x32xf32, #tpu.memory_space<vmem>>, vector<2x32xf32>
    %c137 = arith.constant 137 : index
    %c0_121 = arith.constant 0 : index
    %158 = vector.load %arg6[%c137, %c0_121] : memref<320x32xf32, #tpu.memory_space<vmem>>, vector<2x32xf32>
    %159 = tpu.concatenate %157, %158 in 1 : vector<2x32xf32>, vector<2x32xf32> -> vector<2x64xf32>
    %c296_122 = arith.constant 296 : index
    %c0_123 = arith.constant 0 : index
    %160 = vector.load %arg6[%c296_122, %c0_123] : memref<320x32xf32, #tpu.memory_space<vmem>>, vector<2x32xf32>
    %c297 = arith.constant 297 : index
    %c0_124 = arith.constant 0 : index
    %161 = vector.load %arg6[%c297, %c0_124] : memref<320x32xf32, #tpu.memory_space<vmem>>, vector<2x32xf32>
    %162 = tpu.concatenate %160, %161 in 1 : vector<2x32xf32>, vector<2x32xf32> -> vector<2x64xf32>
    %163 = tpu.concatenate %159, %162 in 0 : vector<2x64xf32>, vector<2x64xf32> -> vector<4x64xf32>
    %cst_125 = arith.constant dense<0.000000e+00> : vector<4x32xf32>
    %164 = tpu.matmul %163, %156, %cst_125 {dimension_numbers = #tpu.dot_dimension_numbers<[1], [0], [0], [1], [0, 0, 1, 1], [], []>} : vector<4x64xf32>, vector<64x32xf32>, vector<4x32xf32> -> vector<4x32xf32>
    %c9 = arith.constant 9 : index
    %c0_126 = arith.constant 0 : index
    %165 = vector.load %arg3[%c9, %c0_126] : memref<11x32xf32, #tpu.memory_space<vmem>>, vector<1x32xf32>
    %166 = vector.broadcast %165 : vector<1x32xf32> to vector<4x32xf32>
    %167 = arith.addf %164, %166 : vector<4x32xf32>
    %168 = vector.extract_strided_slice %167 {offsets = [0, 0], sizes = [2, 32], strides = [1, 1]} : vector<4x32xf32> to vector<2x32xf32>
    %c144 = arith.constant 144 : index
    %c0_127 = arith.constant 0 : index
    %169 = vector.load %arg6[%c144, %c0_127] : memref<320x32xf32, #tpu.memory_space<vmem>>, vector<2x32xf32>
    tpu.vector_store %arg6[%c144, %c0_127], %168 {strides = array<i32>} : memref<320x32xf32, #tpu.memory_space<vmem>>, vector<2x32xf32>,
    %170 = vector.extract_strided_slice %167 {offsets = [2, 0], sizes = [2, 32], strides = [1, 1]} : vector<4x32xf32> to vector<2x32xf32>
    %c304 = arith.constant 304 : index
    %c0_128 = arith.constant 0 : index
    %171 = vector.load %arg6[%c304, %c0_128] : memref<320x32xf32, #tpu.memory_space<vmem>>, vector<2x32xf32>
    tpu.vector_store %arg6[%c304, %c0_128], %170 {strides = array<i32>} : memref<320x32xf32, #tpu.memory_space<vmem>>, vector<2x32xf32>,
    %c672 = arith.constant 672 : index
    %c0_129 = arith.constant 0 : index
    %172 = vector.load %arg2[%c672, %c0_129] : memref<736x32xf32, #tpu.memory_space<vmem>>, vector<64x32xf32>
    %c144_130 = arith.constant 144 : index
    %c0_131 = arith.constant 0 : index
    %173 = vector.load %arg6[%c144_130, %c0_131] : memref<320x32xf32, #tpu.memory_space<vmem>>, vector<1x32xf32>
    %c145 = arith.constant 145 : index
    %c0_132 = arith.constant 0 : index
    %174 = vector.load %arg6[%c145, %c0_132] : memref<320x32xf32, #tpu.memory_space<vmem>>, vector<1x32xf32>
    %175 = tpu.concatenate %173, %174 in 1 : vector<1x32xf32>, vector<1x32xf32> -> vector<1x64xf32>
    %c304_133 = arith.constant 304 : index
    %c0_134 = arith.constant 0 : index
    %176 = vector.load %arg6[%c304_133, %c0_134] : memref<320x32xf32, #tpu.memory_space<vmem>>, vector<1x32xf32>
    %c305 = arith.constant 305 : index
    %c0_135 = arith.constant 0 : index
    %177 = vector.load %arg6[%c305, %c0_135] : memref<320x32xf32, #tpu.memory_space<vmem>>, vector<1x32xf32>
    %178 = tpu.concatenate %176, %177 in 1 : vector<1x32xf32>, vector<1x32xf32> -> vector<1x64xf32>
    %179 = tpu.concatenate %175, %178 in 0 : vector<1x64xf32>, vector<1x64xf32> -> vector<2x64xf32>
    %cst_136 = arith.constant dense<0.000000e+00> : vector<2x32xf32>
    %180 = tpu.matmul %179, %172, %cst_136 {dimension_numbers = #tpu.dot_dimension_numbers<[1], [0], [0], [1], [0, 0, 1, 1], [], []>} : vector<2x64xf32>, vector<64x32xf32>, vector<2x32xf32> -> vector<2x32xf32>
    %c10 = arith.constant 10 : index
    %c0_137 = arith.constant 0 : index
    %181 = vector.load %arg3[%c10, %c0_137] : memref<11x32xf32, #tpu.memory_space<vmem>>, vector<1x32xf32>
    %182 = vector.broadcast %181 : vector<1x32xf32> to vector<2x32xf32>
    %183 = arith.addf %180, %182 : vector<2x32xf32>
    %184 = vector.extract_strided_slice %183 {offsets = [0, 0], sizes = [1, 32], strides = [1, 1]} : vector<2x32xf32> to vector<1x32xf32>
    %c152 = arith.constant 152 : index
    %c0_138 = arith.constant 0 : index
    %185 = vector.load %arg6[%c152, %c0_138] : memref<320x32xf32, #tpu.memory_space<vmem>>, vector<1x32xf32>
    tpu.vector_store %arg6[%c152, %c0_138], %184 {strides = array<i32>} : memref<320x32xf32, #tpu.memory_space<vmem>>, vector<1x32xf32>,
    %186 = vector.extract_strided_slice %183 {offsets = [1, 0], sizes = [1, 32], strides = [1, 1]} : vector<2x32xf32> to vector<1x32xf32>
    %c312 = arith.constant 312 : index
    %c0_139 = arith.constant 0 : index
    %187 = vector.load %arg6[%c312, %c0_139] : memref<320x32xf32, #tpu.memory_space<vmem>>, vector<1x32xf32>
    tpu.vector_store %arg6[%c312, %c0_139], %186 {strides = array<i32>} : memref<320x32xf32, #tpu.memory_space<vmem>>, vector<1x32xf32>,
    %c0_140 = arith.constant 0 : index
    %c0_141 = arith.constant 0 : index
    %188 = vector.load %arg6[%c0_140, %c0_141] : memref<320x32xf32, #tpu.memory_space<vmem>>, vector<160x32xf32>
    %189 = tpu.transpose %188, [1, 0] : vector<160x32xf32> -> vector<32x160xf32>
    %c0_142 = arith.constant 0 : index
    %c0_143 = arith.constant 0 : index
    %190 = vector.load %arg4[%c0_142, %c0_143] : memref<160x256xf32, #tpu.memory_space<vmem>>, vector<160x256xf32>
    %cst_144 = arith.constant dense<0.000000e+00> : vector<32x256xf32>
    %191 = tpu.matmul %189, %190, %cst_144 {dimension_numbers = #tpu.dot_dimension_numbers<[1], [0], [0], [1], [0, 0, 1, 1], [], []>} : vector<32x160xf32>, vector<160x256xf32>, vector<32x256xf32> -> vector<32x256xf32>
    %c0_145 = arith.constant 0 : index
    %c0_146 = arith.constant 0 : index
    %c0_147 = arith.constant 0 : index
    %192 = vector.load %arg5[%c0_145, %c0_146, %c0_147] : memref<2x32x256xf32, #tpu.memory_space<vmem>>, vector<1x32x256xf32>
    %193 = vector.shape_cast %192 : vector<1x32x256xf32> to vector<32x256xf32>
    %194 = vector.shape_cast %191 : vector<32x256xf32> to vector<1x32x256xf32>
    tpu.vector_store %arg5[%c0_145, %c0_146, %c0_147], %194 {strides = array<i32>} : memref<2x32x256xf32, #tpu.memory_space<vmem>>, vector<1x32x256xf32>,
    %c160_148 = arith.constant 160 : index
    %c0_149 = arith.constant 0 : index
    %195 = vector.load %arg6[%c160_148, %c0_149] : memref<320x32xf32, #tpu.memory_space<vmem>>, vector<160x32xf32>
    %196 = tpu.transpose %195, [1, 0] : vector<160x32xf32> -> vector<32x160xf32>
    %c0_150 = arith.constant 0 : index
    %c0_151 = arith.constant 0 : index
    %197 = vector.load %arg4[%c0_150, %c0_151] : memref<160x256xf32, #tpu.memory_space<vmem>>, vector<160x256xf32>
    %cst_152 = arith.constant dense<0.000000e+00> : vector<32x256xf32>
    %198 = tpu.matmul %196, %197, %cst_152 {dimension_numbers = #tpu.dot_dimension_numbers<[1], [0], [0], [1], [0, 0, 1, 1], [], []>} : vector<32x160xf32>, vector<160x256xf32>, vector<32x256xf32> -> vector<32x256xf32>
    %c1_153 = arith.constant 1 : index
    %c0_154 = arith.constant 0 : index
    %c0_155 = arith.constant 0 : index
    %199 = vector.load %arg5[%c1_153, %c0_154, %c0_155] : memref<2x32x256xf32, #tpu.memory_space<vmem>>, vector<1x32x256xf32>
    %200 = vector.shape_cast %199 : vector<1x32x256xf32> to vector<32x256xf32>
    %201 = vector.shape_cast %198 : vector<32x256xf32> to vector<1x32x256xf32>
    tpu.vector_store %arg5[%c1_153, %c0_154, %c0_155], %201 {strides = array<i32>} : memref<2x32x256xf32, #tpu.memory_space<vmem>>, vector<1x32x256xf32>,
    return
  }
  func.func @transform_0(%arg0: i32) -> (i32, i32, i32) {
    %c0_i32 = arith.constant 0 : i32
    %c0_i32_0 = arith.constant 0 : i32
    %c0_i32_1 = arith.constant 0 : i32
    return %arg0, %c0_i32, %c0_i32_0 : i32, i32, i32
  }
  func.func @transform_1(%arg0: i32) -> (i32, i32) {
    %c0_i32 = arith.constant 0 : i32
    %c0_i32_0 = arith.constant 0 : i32
    %c0_i32_1 = arith.constant 0 : i32
    return %c0_i32, %c0_i32_0 : i32, i32
  }
  func.func @transform_2(%arg0: i32) -> (i32, i32) {
    %c0_i32 = arith.constant 0 : i32
    %c0_i32_0 = arith.constant 0 : i32
    %c0_i32_1 = arith.constant 0 : i32
    return %c0_i32, %c0_i32_0 : i32, i32
  }
  func.func @transform_3(%arg0: i32) -> (i32, i32) {
    %c0_i32 = arith.constant 0 : i32
    %c0_i32_0 = arith.constant 0 : i32
    %c0_i32_1 = arith.constant 0 : i32
    return %c0_i32, %c0_i32_0 : i32, i32
  }
  func.func @transform_4(%arg0: i32) -> (i32, i32, i32) {
    %c0_i32 = arith.constant 0 : i32
    %c0_i32_0 = arith.constant 0 : i32
    %c0_i32_1 = arith.constant 0 : i32
    return %arg0, %c0_i32, %c0_i32_0 : i32, i32, i32
  }
}

</mosaic_0001>

<bundles_post_ra>
// kernel: _forward_impl.1
= control target key start
LH: loop header
LB: loop body
LE: loop exit
PB: predicated region body
PF: predicated region fallthrough
CT: control target
= control target key end

     0   :  { %9 = vsyncpa [#allocation4], 0  ;;  %s3372_s0 = inlined_call_operand.vmem [shape: f32[2,32,16], index: 0, kind: input, shape index: {}]   ;;  %s3373_s1 = inlined_call_operand.hbm [shape: f32[736,32], index: 1, kind: input, shape index: {}]   ;;  %s3374_s2 = inlined_call_operand.vmem [shape: f32[11,32], index: 2, kind: input, shape index: {}]   ;;  %s3375_s3 = inlined_call_operand.hbm [shape: f32[160,256], index: 3, kind: input, shape index: {}]   ;;  %s3376_s4 = inlined_call_operand.vmem [shape: f32[2,32,256], index: 4, kind: output, shape index: {}]  }
   0x1   :  { %10 = vsyncpa [#allocation6], 0  ;;  %s2884_s15 = smov [#allocation3]   ;;  %s2836_s19 = scalar_lea.hbm %s3373_s1, 11776 }
   0x2   :  { %s18_s16 = sshll.u32 %s2884_s15, 4  ;;  %p2837_p0 = scmp.ne.s32.totalorder %s3373_s1, %s2836_s19  ;;  %s19_s16 = int_to_ptr.vmem [resolvable:$true] %s18_s16 }
   0x3   :  { %p2840_p1 = scmp.lt.u32.totalorder %s2836_s19, %s3373_s1 }
   0x5   :  { %p2842_p2 = pnand %p2840_p1, %p2837_p0 }
   0x7   :  { %2845 = shalt.err (!%p2842_p2)
}
   0x8   :  { %s2846_s24 = scalar_lea.vmem %s19_s16, 11776  ;;  %p2851_p4 = scmp.lt.s32.totalorder %s19_s16, %s19_s16 }
   0x9   :  { %p2847_p3 = scmp.ne.s32.totalorder %s19_s16, %s2846_s24  ;;  %p2852_p5 = scmp.lt.s32.totalorder %s2846_s24, %s2846_s24 }
   0xb   :  { %p2853_p6 = por %p2852_p5, %p2851_p4 }
   0xd   :  { %p2854_p7 = pnand %p2853_p6, %p2847_p3 }
   0xf   :  { %2857 = shalt.err (!%p2854_p7)
}
  0x10   :  { %s2885_s25 = smov 128   ;;  %s2886_s26 = smov 8  }
  0x11   :  { %24 = dma.hbm_to_vmem [thread:$0]  %s3373_s1, 11776, %s19_s16, [#allocation4], %s2885_s25, %s2885_s25, %s2886_s26  }
  0x12   :  { %s2887_s29 = smov [#allocation5]   ;;  %s2858_s7 = scalar_lea.hbm %s3375_s3, 5120 }
  0x13   :  { %s32_s30 = sshll.u32 %s2887_s29, 4  ;;  %p2859_p8 = scmp.ne.s32.totalorder %s3375_s3, %s2858_s7  ;;  %s33_s30 = int_to_ptr.vmem [resolvable:$true] %s32_s30 }
  0x14   :  { %p2862_p9 = scmp.lt.u32.totalorder %s2858_s7, %s3375_s3 }
  0x16   :  { %p2864_p10 = pnand %p2862_p9, %p2859_p8 }
  0x18   :  { %2867 = shalt.err (!%p2864_p10)
}
  0x19   :  { %s2868_s12 = scalar_lea.vmem %s33_s30, 5120  ;;  %p2873_p12 = scmp.lt.s32.totalorder %s33_s30, %s33_s30 }
  0x1a   :  { %p2869_p11 = scmp.ne.s32.totalorder %s33_s30, %s2868_s12  ;;  %p2874_p13 = scmp.lt.s32.totalorder %s2868_s12, %s2868_s12 }
  0x1c   :  { %p2875_p0 = por %p2874_p13, %p2873_p12 }
  0x1e   :  { %p2876_p1 = pnand %p2875_p0, %p2869_p11 }
  0x20   :  { %2879 = shalt.err (!%p2876_p1)
}
  0x21   :  { %s2888_s1 = smov 256   ;;  %s2889_s13 = smov 16  }
  0x22   :  { %38 = dma.hbm_to_vmem [thread:$0]  %s3375_s3, 5120, %s33_s30, [#allocation6], %s2888_s1, %s2888_s1, %s2889_s13  }
  0x23   :  { %2880 = dma.done.wait [#allocation4], 11776  }
  0x24   :  { %2881 = vsyncadd [#allocation4], 4294955520 }
  0x25   :  { %2882 = dma.done.wait [#allocation6], 5120  }
  0x26   :  { %2883 = vsyncadd [#allocation6], 4294962176  ;;  %vm45_vm0 = vcmask 261120   ;;  %v2890_v0 = vmov 0.0   ;;  %v2112_v1 = vld [vmem:[%s3372_s0 + $0x20] sm:$0xff]  ;;  %v2113_v3 = vld [vmem:[%s3372_s0 + $0x28] sm:$0xff] }
  0x27   :  { %66 = vst.msk [vmem:[#allocation2 + $0xa0] sm:$0xff] %vm45_vm0, %v2890_v0  ;;  %46 = vst.msk [vmem:[#allocation2] sm:$0xff] %vm45_vm0, %v2890_v0  ;;  %v86_v2 = vld [vmem:[%s3372_s0] sm:$0xff]  ;;  %129 = vxpose.xlu0.b32.start [1/4] (short) (narrow) %v2112_v1, 16  ;;  %v87_v4 = vld [vmem:[%s3372_s0 + $0x8] sm:$0xff]  ;;  %vm212_vm1 = vcmask 523264  }
  0x28   :  { %47 = vst.msk [vmem:[#allocation2 + $0x8] sm:$0xff] %vm45_vm0, %v2890_v0  ;;  %48 = vst.msk [vmem:[#allocation2 + $0x10] sm:$0xff] %vm45_vm0, %v2890_v0  ;;  %90 = vxpose.xlu1.b32.start [1/4] (short) (narrow) %v86_v2, 16  ;;  %v2114_v5 = vld [vmem:[%s3372_s0 + $0x30] sm:$0xff]  ;;  %v2115_v7 = vld [vmem:[%s3372_s0 + $0x38] sm:$0xff]  ;;  %vm201_vm2 = vcmask 1046528  }
  0x29   :  { %49 = vst.msk [vmem:[#allocation2 + $0x18] sm:$0xff] %vm45_vm0, %v2890_v0  ;;  %50 = vst.msk [vmem:[#allocation2 + $0x20] sm:$0xff] %vm45_vm0, %v2890_v0  ;;  %v88_v6 = vld [vmem:[%s3372_s0 + $0x10] sm:$0xff]  ;;  %v89_v8 = vld [vmem:[%s3372_s0 + $0x18] sm:$0xff]  ;;  %s2891_s0 = smov 32   ;;  %vm309_vm3 = vcmask 260096  }
  0x2a   :  { %51 = vst.msk [vmem:[#allocation2 + $0x28] sm:$0xff] %vm45_vm0, %v2890_v0  ;;  %52 = vst.msk [vmem:[#allocation2 + $0x30] sm:$0xff] %vm45_vm0, %v2890_v0  ;;  %v163_v9 = vld [vmem:[#allocation3] sm:$0xff]  ;;  %v164_v10 = vld [vmem:[#allocation3 + $0x8] sm:$0xff]  ;;  %vm311_vm4 = vcmask 261127   ;;  %vm314_vm5 = vcmask 259072  }
  0x2b   :  { %53 = vst.msk [vmem:[#allocation2 + $0x38] sm:$0xff] %vm45_vm0, %v2890_v0  ;;  %54 = vst.msk [vmem:[#allocation2 + $0x40] sm:$0xff] %vm45_vm0, %v2890_v0  ;;  %130 = vxpose.xlu0.b32.cont [2/4] (short) (narrow) %v2113_v3, 16  ;;  %v165_v11 = vld [vmem:[#allocation3 + $0x10] sm:$0xff]  ;;  %v2541_v12 = vpack.c.bf16 %v164_v10, %v163_v9  ;;  %v166_v13 = vld [vmem:[#allocation3 + $0x18] sm:$0xff]  ;;  %vm354_vm6 = vcmask 1045504  }
  0x2c   :  { %55 = vst.msk [vmem:[#allocation2 + $0x48] sm:$0xff] %vm45_vm0, %v2890_v0  ;;  %56 = vst.msk [vmem:[#allocation2 + $0x50] sm:$0xff] %vm45_vm0, %v2890_v0  ;;  %91 = vxpose.xlu1.b32.cont [2/4] (short) (narrow) %v87_v4, 16  ;;  %v2545_v14 = vpack.c.bf16 %v166_v13, %v165_v11  ;;  %v167_v15 = vld [vmem:[#allocation3 + $0x20] sm:$0xff]  ;;  %v168_v16 = vld [vmem:[#allocation3 + $0x28] sm:$0xff]  ;;  %vm462_vm7 = vcmask 261126  }
  0x2d   :  { %57 = vst.msk [vmem:[#allocation2 + $0x58] sm:$0xff] %vm45_vm0, %v2890_v0  ;;  %58 = vst.msk [vmem:[#allocation2 + $0x60] sm:$0xff] %vm45_vm0, %v2890_v0  ;;  %2542 = vmatprep.subr.bf16.mxu0 %v2541_v12  ;;  %v2549_v17 = vpack.c.bf16 %v168_v16, %v167_v15  ;;  %v169_v18 = vld [vmem:[#allocation3 + $0x30] sm:$0xff]  ;;  %v170_v19 = vld [vmem:[#allocation3 + $0x38] sm:$0xff]  ;;  %vm465_vm8 = vcmask 257024   ;;  %vm505_vm9 = vcmask 1044480  }
  0x2e   :  { %59 = vst.msk [vmem:[#allocation2 + $0x68] sm:$0xff] %vm45_vm0, %v2890_v0  ;;  %60 = vst.msk [vmem:[#allocation2 + $0x70] sm:$0xff] %vm45_vm0, %v2890_v0  ;;  %2544 = vmatpush3.bf16.msra.mxu0 %v2541_v12  ;;  %v2553_v22 = vpack.c.bf16 %v170_v19, %v169_v18  ;;  %v316_v45 = vld [vmem:[#allocation3 + $0x40] sm:$0xff]  ;;  %v317_v46 = vld [vmem:[#allocation3 + $0x48] sm:$0xff]  ;;  %vm612_vm10 = vcmask 258048   ;;  %vm614_vm11 = vcmask 261125  }
  0x2f   :  { %61 = vst.msk [vmem:[#allocation2 + $0x78] sm:$0xff] %vm45_vm0, %v2890_v0  ;;  %62 = vst.msk [vmem:[#allocation2 + $0x80] sm:$0xff] %vm45_vm0, %v2890_v0  ;;  %131 = vxpose.xlu0.b32.cont [3/4] (short) (narrow) %v2114_v5, 16  ;;  %2546 = vmatprep.subr.bf16.mxu0 %v2545_v14  ;;  %v2557_v47 = vpack.c.bf16 %v317_v46, %v316_v45  ;;  %v2116_v48 = vld [vmem:[%s3374_s2] ss:$0 sm:$0xff]  ;;  %v318_v49 = vld [vmem:[#allocation3 + $0x50] sm:$0xff] }
  0x30   :  { %63 = vst.msk [vmem:[#allocation2 + $0x88] sm:$0xff] %vm45_vm0, %v2890_v0  ;;  %64 = vst.msk [vmem:[#allocation2 + $0x90] sm:$0xff] %vm45_vm0, %v2890_v0  ;;  %92 = vxpose.xlu1.b32.cont [3/4] (short) (narrow) %v88_v6, 16  ;;  %v319_v50 = vld [vmem:[#allocation3 + $0x58] sm:$0xff]  ;;  %v320_v53 = vld [vmem:[#allocation3 + $0x60] sm:$0xff]  ;;  %vm2893_vm12 = vmmov 0  }
  0x31   :  { %65 = vst.msk [vmem:[#allocation2 + $0x98] sm:$0xff] %vm45_vm0, %v2890_v0  ;;  %67 = vst.msk [vmem:[#allocation2 + $0xa8] sm:$0xff] %vm45_vm0, %v2890_v0  ;;  %2558 = vmatprep.subr.bf16.mxu1 %v2557_v47  ;;  %v2561_v51 = vpack.c.bf16 %v319_v50, %v318_v49  ;;  %v321_v54 = vld [vmem:[#allocation3 + $0x68] sm:$0xff]  ;;  %v322_v59 = vld [vmem:[#allocation3 + $0x70] sm:$0xff]  ;;  %vm617_vm13 = vcmask 254976   ;;  %vm657_vm14 = vcmask 1043456  }
  0x32   :  { %68 = vst.msk [vmem:[#allocation2 + $0xb0] sm:$0xff] %vm45_vm0, %v2890_v0  ;;  %69 = vst.msk [vmem:[#allocation2 + $0xb8] sm:$0xff] %vm45_vm0, %v2890_v0  ;;  %2548 = vmatpush3.bf16.msra.mxu0 %v2545_v14  ;;  %2560 = vmatpush3.bf16.msra.mxu1 %v2557_v47  ;;  %v2565_v57 = vpack.c.bf16 %v321_v54, %v320_v53  ;;  %v323_v60 = vld [vmem:[#allocation3 + $0x78] sm:$0xff]  ;;  %vm758_vm15 = vcmask 261124   ;;  %s2894_s17 = smov 64  }
  0x33   :  { %70 = vst.msk [vmem:[#allocation2 + $0xc0] sm:$0xff] %vm45_vm0, %v2890_v0  ;;  %71 = vst.msk [vmem:[#allocation2 + $0xc8] sm:$0xff] %vm45_vm0, %v2890_v0  ;;  %132 = vxpose.xlu0.b32.end [4/4] (short) (narrow) %v2115_v7, 16  ;;  %2550 = vmatprep.subr.bf16.mxu0 %v2549_v17  ;;  %v2569_v62 = vpack.c.bf16 %v323_v60, %v322_v59 }
  0x34   :  { %72 = vst.msk [vmem:[#allocation2 + $0xd0] sm:$0xff] %vm45_vm0, %v2890_v0  ;;  %73 = vst.msk [vmem:[#allocation2 + $0xd8] sm:$0xff] %vm45_vm0, %v2890_v0  ;;  %93 = vxpose.xlu1.b32.end [4/4] (short) (narrow) %v89_v8, 16  ;;  %2562 = vmatprep.subr.bf16.mxu1 %v2561_v51 }
  0x35   :  { %74 = vst.msk [vmem:[#allocation2 + $0xe0] sm:$0xff] %vm45_vm0, %v2890_v0  ;;  %75 = vst.msk [vmem:[#allocation2 + $0xe8] sm:$0xff] %vm45_vm0, %v2890_v0 }
  0x36   :  { %76 = vst.msk [vmem:[#allocation2 + $0xf0] sm:$0xff] %vm45_vm0, %v2890_v0  ;;  %77 = vst.msk [vmem:[#allocation2 + $0xf8] sm:$0xff] %vm45_vm0, %v2890_v0  ;;  %2552 = vmatpush3.bf16.msra.mxu0 %v2549_v17  ;;  %2564 = vmatpush3.bf16.msra.mxu1 %v2561_v51 }
  0x37   :  { %78 = vst.msk [vmem:[#allocation2 + $0x100] sm:$0xff] %vm45_vm0, %v2890_v0  ;;  %79 = vst.msk [vmem:[#allocation2 + $0x108] sm:$0xff] %vm45_vm0, %v2890_v0  ;;  %2554 = vmatprep.subr.bf16.mxu0 %v2553_v22  ;;  %2566 = vmatprep.subr.bf16.mxu1 %v2565_v57 }
  0x38   :  { %80 = vst.msk [vmem:[#allocation2 + $0x110] sm:$0xff] %vm45_vm0, %v2890_v0  ;;  %81 = vst.msk [vmem:[#allocation2 + $0x118] sm:$0xff] %vm45_vm0, %v2890_v0 }
  0x39   :  { %82 = vst.msk [vmem:[#allocation2 + $0x120] sm:$0xff] %vm45_vm0, %v2890_v0  ;;  %83 = vst.msk [vmem:[#allocation2 + $0x128] sm:$0xff] %vm45_vm0, %v2890_v0 }
  0x3a   :  { %84 = vst.msk [vmem:[#allocation2 + $0x130] sm:$0xff] %vm45_vm0, %v2890_v0  ;;  %85 = vst.msk [vmem:[#allocation2 + $0x138] sm:$0xff] %vm45_vm0, %v2890_v0  ;;  %2556 = vmatpush3.bf16.msra.mxu0 %v2553_v22  ;;  %2568 = vmatpush3.bf16.msra.mxu1 %v2565_v57 }
  0x3b   :  { %2570 = vmatprep.subr.bf16.mxu1 %v2569_v62 }
  0x3e   :  { %2572 = vmatpush3.bf16.msra.mxu1 %v2569_v62 }
  0xa7   :  { %v145_v20 = vpop.trf.xlu0 }
  0xa8   :  { %v106_v21 = vpop.trf.xlu1  ;;  %161 = vst.msk [vmem:[#allocation2 + $0xa0] sm:$0xff] %vm45_vm0, %v145_v20 }
  0xa9   :  { %122 = vst.msk [vmem:[#allocation2] sm:$0xff] %vm45_vm0, %v106_v21 }
  0xab   :  { %v146_v23 = vpop.trf.xlu0 }
  0xac   :  { %v107_v24 = vpop.trf.xlu1  ;;  %162 = vst.msk [vmem:[#allocation2 + $0xa8] sm:$0xff] %vm45_vm0, %v146_v23  ;;  %v467_v23 = vld [vmem:[#allocation3 + $0x80] sm:$0xff] }
  0xad   :  { %123 = vst.msk [vmem:[#allocation2 + $0x8] sm:$0xff] %vm45_vm0, %v107_v24  ;;  %v468_v24 = vld [vmem:[#allocation3 + $0x88] sm:$0xff] }
  0xaf   :  { %v185_v30 = vld [vmem:[#allocation2 + $0xa0] sm:$0xff] }
  0xb0   :  { %v171_v32 = vld [vmem:[#allocation2] sm:$0xff] }
  0xb3   :  { %v187_v25 = vld [vmem:[#allocation2 + $0xa1] sm:$0xff]  ;;  %v188_v28 = vld [vmem:[#allocation2 + $0xa9] sm:$0x7f] }
  0xb4   :  { %v173_v26 = vld [vmem:[#allocation2 + $0x1] sm:$0xff]  ;;  %191 = vrot.lane.b32.xlu0 %v187_v25, %s2891_s0  ;;  %v174_v27 = vld [vmem:[#allocation2 + $0x9] sm:$0x7f]  ;;  %v469_v25 = vld [vmem:[#allocation3 + $0x90] sm:$0xff] }
  0xb5   :  { %177 = vrot.lane.b32.xlu1 %v173_v26, %s2891_s0  ;;  %v172_v36 = vld [vmem:[#allocation2 + $0x8] sm:$0x7f]  ;;  %v2573_v26 = vpack.c.bf16 %v468_v24, %v467_v23 }
  0xb6   :  { %v186_v40 = vld [vmem:[#allocation2 + $0xa8] sm:$0x7f] }
  0xb7   :  { %2574 = vmatprep.subr.bf16.mxu0 %v2573_v26 }
  0xb9   :  { %179 = vrot.lane.b32.xlu1 %v174_v27, %s2891_s0  ;;  %v470_v27 = vld [vmem:[#allocation3 + $0x98] sm:$0xff] }
  0xbd   :  { %193 = vrot.lane.b32.xlu1 %v188_v28, %s2891_s0  ;;  %v2577_v28 = vpack.c.bf16 %v470_v27, %v469_v25 }
 0x126   :  { %v192_v29 = vpop.permute.xlu0 %191 }
 0x127   :  { %v178_v31 = vpop.permute.xlu1 %177  ;;  %v197_v33 = vsel %vm45_vm0, %v185_v30, %v192_v29  ;;  %v2121_v29 = vld [vmem:[%s3374_s2 + $0x1] ss:$0 sm:$0xff] }
 0x128   :  { %v183_v34 = vsel %vm45_vm0, %v171_v32, %v178_v31  ;;  %v202_v35 = vrot.slane %v197_v33, 1  ;;  %v471_v30 = vld [vmem:[#allocation3 + $0xa0] sm:$0xff]  ;;  %v472_v31 = vld [vmem:[#allocation3 + $0xa8] sm:$0xff] }
 0x129   :  { %2307 = vmatprep.mubr.msk.f32.mxu0 %vm212_vm1, %v183_v34  ;;  %v2581_v33 = vpack.c.bf16 %v472_v31, %v471_v30 }
 0x12b   :  { %v180_v37 = vpop.permute.xlu1 %179 }
 0x12c   :  { %v184_v38 = vsel %vm45_vm0, %v172_v36, %v180_v37  ;;  %v473_v37 = vld [vmem:[#allocation3 + $0xb0] sm:$0xff] }
 0x12d   :  { %v206_v39 = vsel %vm201_vm2, %v184_v38, %v202_v35  ;;  %v474_v38 = vld [vmem:[#allocation3 + $0xb8] sm:$0xff] }
 0x12e   :  { %2308 = vmatmul.mubr.msk.f32.vlgmr.msra.gmra.mrb[0].mxu0 %vm212_vm1, %v206_v39 }
 0x12f   :  { %v194_v41 = vpop.permute.xlu1 %193  ;;  %2576 = vmatpush3.bf16.msra.mxu0 %v2573_v26 }
 0x130   :  { %v198_v42 = vsel %vm45_vm0, %v186_v40, %v194_v41  ;;  %2578 = vmatprep.subr.bf16.mxu0 %v2577_v28  ;;  %v2585_v40 = vpack.c.bf16 %v474_v38, %v473_v37 }
 0x131   :  { %v203_v43 = vrot.slane %v198_v42, 1 }
 0x133   :  { %v204_v44 = vsel %vm201_vm2, %v202_v35, %v203_v43  ;;  %2580 = vmatpush3.bf16.msra.mxu0 %v2577_v28  ;;  %vm799_vm2 = vcmask 1042432  }
 0x134   :  { %2310 = vmatprep.mubr.msk.f32.mxu0 %vm212_vm1, %v204_v44  ;;  %2582 = vmatprep.subr.bf16.mxu0 %v2581_v33 }
 0x135   :  { %2311 = vmatmul.mubr.msk.f32.gmra.mrb[2].mxu0 %vm212_vm1, %v203_v43 }
 0x137   :  { %2584 = vmatpush3.bf16.msra.mxu0 %v2581_v33 }
 0x138   :  { %2586 = vmatprep.subr.bf16.mxu0 %v2585_v40 }
 0x13b   :  { %2588 = vmatpush3.bf16.msra.mxu0 %v2585_v40 }
 0x201   :  { %v2309_v52 = vpop.f32.mrb[0].mxu0 }
 0x202   :  { %v295_v55 = vadd.f32 %v2309_v52, %v2116_v48  ;;  %v289_v56 = vpop.f32.mrb[1].mxu0 }
 0x203   :  { %v290_v58 = vadd.f32 %v2116_v48, %v289_v56 }
 0x204   :  { %310 = vst.msk [vmem:[#allocation2 + $0x18] sm:$0x7f] %vm309_vm3, %v295_v55  ;;  %vm899_vm3 = vcmask 256000  }
 0x205   :  { %312 = vst.msk [vmem:[#allocation2 + $0xa9] sm:$0x80] %vm311_vm4, %v295_v55  ;;  %vm901_vm4 = vcmask 261123  }
 0x206   :  { %308 = vst.msk [vmem:[#allocation2 + $0x10] sm:$0xff] %vm45_vm0, %v290_v58 }
 0x208   :  { %v2312_v61 = vpop.f32.mrb[2].mxu0 }
 0x209   :  { %v305_v63 = vadd.f32 %v2312_v61, %v2116_v48  ;;  %v299_v1 = vpop.f32.mrb[3].mxu0 }
 0x20a   :  { %v300_v2 = vadd.f32 %v2116_v48, %v299_v1  ;;  %v619_v1 = vld [vmem:[#allocation3 + $0xc0] sm:$0xff] }
 0x20b   :  { %315 = vst.msk [vmem:[#allocation2 + $0xb9] sm:$0x3f] %vm314_vm5, %v305_v63  ;;  %v327_v6 = vld [vmem:[#allocation2 + $0x19] sm:$0x3f] }
 0x20c   :  { %313 = vst.msk [vmem:[#allocation2 + $0xb1] sm:$0xff] %vm45_vm0, %v300_v2  ;;  %v325_v18 = vld [vmem:[#allocation2 + $0x18] sm:$0x3f]  ;;  %v620_v2 = vld [vmem:[#allocation3 + $0xc8] sm:$0xff] }
 0x20d   :  { %v326_v3 = vld [vmem:[#allocation2 + $0x11] sm:$0xff] }
 0x20e   :  { %330 = vrot.lane.b32.xlu0 %v326_v3, %s2891_s0  ;;  %v324_v8 = vld [vmem:[#allocation2 + $0x10] sm:$0xff] }
 0x20f   :  { %v621_v3 = vld [vmem:[#allocation3 + $0xd0] sm:$0xff] }
 0x212   :  { %v341_v4 = vld [vmem:[#allocation2 + $0xb9] sm:$0x3f] }
 0x213   :  { %346 = vrot.lane.b32.xlu0 %v341_v4, %s2891_s0  ;;  %v340_v5 = vld [vmem:[#allocation2 + $0xb1] sm:$0xff]  ;;  %v2892_v4 = vmov 0.0|0.0  }
 0x214   :  { %344 = vrot.lane.b32.xlu1 %v340_v5, %s2891_s0  ;;  %v339_v10 = vld [vmem:[#allocation2 + $0xb8] sm:$0x3f]  ;;  %v338_v14 = vld [vmem:[#allocation2 + $0xb0] sm:$0xff]  ;;  %2589 = vmatprep.subr.bf16.mxu1 %v2892_v4  ;;  %v2590_v5 = vpack.c.bf16 %v620_v2, %v619_v1 }
 0x215   :  { %2601 = vmatprep.subr.bf16.mxu0 %v2892_v4 }
 0x218   :  { %332 = vrot.lane.b32.xlu1 %v327_v6, %s2891_s0  ;;  %v622_v6 = vld [vmem:[#allocation3 + $0xd8] sm:$0xff] }
 0x280   :  { %v331_v7 = vpop.permute.xlu0 %330 }
 0x281   :  { %v336_v9 = vsel %vm45_vm0, %v324_v8, %v331_v7  ;;  %v2593_v7 = vpack.c.bf16 %v622_v6, %v621_v3  ;;  %v623_v8 = vld [vmem:[#allocation3 + $0xe0] sm:$0xff] }
 0x282   :  { %2329 = vmatprep.mubr.msk.f32.mxu1 %vm212_vm1, %v336_v9  ;;  %v624_v9 = vld [vmem:[#allocation3 + $0xe8] sm:$0xff] }
 0x285   :  { %v347_v11 = vpop.permute.xlu0 %346 }
 0x286   :  { %v351_v12 = vsel %vm45_vm0, %v339_v10, %v347_v11  ;;  %v345_v13 = vpop.permute.xlu1 %344  ;;  %v2596_v10 = vpack.c.bf16 %v624_v9, %v623_v8  ;;  %v625_v11 = vld [vmem:[#allocation3 + $0xf0] sm:$0xff] }
 0x287   :  { %v350_v15 = vsel %vm45_vm0, %v338_v14, %v345_v13  ;;  %v356_v16 = vrot.slane %v351_v12, 2  ;;  %v626_v12 = vld [vmem:[#allocation3 + $0xf8] sm:$0xff]  ;;  %v2126_v14 = vld [vmem:[%s3374_s2 + $0x2] ss:$0 sm:$0xff] }
 0x288   :  { %v355_v17 = vrot.slane %v350_v15, 2  ;;  %v2599_v13 = vpack.c.bf16 %v626_v12, %v625_v11 }
 0x28a   :  { %v333_v19 = vpop.permute.xlu1 %332  ;;  %v357_v22 = vsel %vm354_vm6, %v355_v17, %v356_v16 }
 0x28b   :  { %v337_v20 = vsel %vm45_vm0, %v325_v18, %v333_v19 }
 0x28c   :  { %v359_v21 = vsel %vm354_vm6, %v337_v20, %v355_v17  ;;  %vm1043_vm6 = vcmask 261122  }
 0x28d   :  { %2330 = vmatmul.mubr.msk.f32.vlgmr.msra.gmra.mrb[0].mxu1 %vm212_vm1, %v359_v21 }
 0x28e   :  { %2332 = vmatprep.mubr.msk.f32.mxu1 %vm212_vm1, %v357_v22  ;;  %2591 = vmatpush3.bf16.msra.mxu1 %v2590_v5 }
 0x28f   :  { %2592 = vmatprep.subr.bf16.mxu1 %v2892_v4 }
 0x291   :  { %2333 = vmatmul.mubr.msk.f32.gmra.mrb[2].mxu1 %vm212_vm1, %v356_v16 }
 0x292   :  { %2594 = vmatpush3.bf16.msra.mxu1 %v2593_v7  ;;  %2373 = vmatprep.mubr.msk.f32.mxu1 %vm2893_vm12, %v2890_v0 }
 0x293   :  { %2595 = vmatprep.subr.bf16.mxu1 %v2892_v4 }
 0x296   :  { %2597 = vmatpush3.bf16.msra.mxu1 %v2596_v10 }
 0x297   :  { %2598 = vmatprep.subr.bf16.mxu1 %v2892_v4 }
 0x29a   :  { %2600 = vmatpush3.bf16.msra.mxu1 %v2599_v13 }
 0x29b   :  { %2613 = vmatprep.subr.bf16.mxu1 %v2892_v4 }
 0x360   :  { %v2331_v32 = vpop.f32.mrb[0].mxu1 }
 0x361   :  { %v447_v34 = vadd.f32 %v2331_v32, %v2121_v29  ;;  %v441_v35 = vpop.f32.mrb[1].mxu1 }
 0x362   :  { %v442_v36 = vadd.f32 %v2121_v29, %v441_v35 }
 0x363   :  { %461 = vst.msk [vmem:[#allocation2 + $0x28] sm:$0x3f] %vm314_vm5, %v447_v34 }
 0x364   :  { %463 = vst.msk [vmem:[#allocation2 + $0xba] sm:$0xc0] %vm462_vm7, %v447_v34  ;;  %v2334_v39 = vpop.f32.mrb[2].mxu1  ;;  %vm1084_vm7 = vcmask 1040384  }
 0x365   :  { %460 = vst.msk [vmem:[#allocation2 + $0x20] sm:$0xff] %vm45_vm0, %v442_v36  ;;  %v457_v41 = vadd.f32 %v2334_v39, %v2121_v29  ;;  %v451_v42 = vpop.f32.mrb[3].mxu1 }
 0x366   :  { %v452_v43 = vadd.f32 %v2121_v29, %v451_v42 }
 0x367   :  { %466 = vst.msk [vmem:[#allocation2 + $0xca] sm:$0xf] %vm465_vm8, %v457_v41 }
 0x368   :  { %464 = vst.msk [vmem:[#allocation2 + $0xc2] sm:$0xff] %vm45_vm0, %v452_v43  ;;  %v761_v43 = vld [vmem:[#allocation3 + $0x100] sm:$0xff] }
 0x36a   :  { %v478_v47 = vld [vmem:[#allocation2 + $0x29] sm:$0x1f] }
 0x36b   :  { %v476_v59 = vld [vmem:[#allocation2 + $0x28] sm:$0x1f] }
 0x36c   :  { %v477_v44 = vld [vmem:[#allocation2 + $0x21] sm:$0xff] }
 0x36d   :  { %481 = vrot.lane.b32.xlu0 %v477_v44, %s2891_s0  ;;  %v475_v49 = vld [vmem:[#allocation2 + $0x20] sm:$0xff]  ;;  %v762_v44 = vld [vmem:[#allocation3 + $0x108] sm:$0xff] }
 0x36f   :  { %v491_v45 = vld [vmem:[#allocation2 + $0xc1] sm:$0xff]  ;;  %v492_v46 = vld [vmem:[#allocation2 + $0xc9] sm:$0x1f] }
 0x370   :  { %495 = vrot.lane.b32.xlu1 %v491_v45, %s2891_s0  ;;  %v489_v52 = vld [vmem:[#allocation2 + $0xc0] sm:$0xff]  ;;  %v490_v53 = vld [vmem:[#allocation2 + $0xc8] sm:$0x1f]  ;;  %v763_v45 = vld [vmem:[#allocation3 + $0x110] sm:$0xff] }
 0x371   :  { %497 = vrot.lane.b32.xlu0 %v492_v46, %s2891_s0  ;;  %v2602_v46 = vpack.c.bf16 %v762_v44, %v761_v43 }
 0x374   :  { %483 = vrot.lane.b32.xlu1 %v478_v47, %s2891_s0  ;;  %v764_v47 = vld [vmem:[#allocation3 + $0x118] sm:$0xff] }
 0x3df   :  { %v482_v48 = vpop.permute.xlu0 %481 }
 0x3e0   :  { %v487_v50 = vsel %vm45_vm0, %v475_v49, %v482_v48  ;;  %v2605_v48 = vpack.c.bf16 %v764_v47, %v763_v45  ;;  %v765_v49 = vld [vmem:[#allocation3 + $0x120] sm:$0xff] }
 0x3e1   :  { %2351 = vmatprep.mubr.msk.f32.mxu0 %vm212_vm1, %v487_v50  ;;  %v766_v50 = vld [vmem:[#allocation3 + $0x128] sm:$0xff] }
 0x3e2   :  { %v496_v51 = vpop.permute.xlu1 %495 }
 0x3e3   :  { %v498_v54 = vpop.permute.xlu0 %497  ;;  %v501_v55 = vsel %vm45_vm0, %v489_v52, %v496_v51  ;;  %v2608_v51 = vpack.c.bf16 %v766_v50, %v765_v49  ;;  %v767_v52 = vld [vmem:[#allocation3 + $0x130] sm:$0xff] }
 0x3e4   :  { %v502_v56 = vsel %vm45_vm0, %v490_v53, %v498_v54  ;;  %v506_v57 = vrot.slane %v501_v55, 3  ;;  %v768_v53 = vld [vmem:[#allocation3 + $0x138] sm:$0xff]  ;;  %v2131_v55 = vld [vmem:[%s3374_s2 + $0x3] ss:$0 sm:$0xff] }
 0x3e5   :  { %v507_v58 = vrot.slane %v502_v56, 3  ;;  %v2611_v54 = vpack.c.bf16 %v768_v53, %v767_v52 }
 0x3e6   :  { %v484_v60 = vpop.permute.xlu1 %483 }
 0x3e7   :  { %v488_v61 = vsel %vm45_vm0, %v476_v59, %v484_v60  ;;  %v508_v63 = vsel %vm505_vm9, %v506_v57, %v507_v58 }
 0x3e8   :  { %v510_v62 = vsel %vm505_vm9, %v488_v61, %v506_v57  ;;  %vm1184_vm9 = vcmask 253952  }
 0x3e9   :  { %2352 = vmatmul.mubr.msk.f32.vlgmr.msra.gmra.mrb[4].mxu0 %vm212_vm1, %v510_v62 }
 0x3ea   :  { %2354 = vmatprep.mubr.msk.f32.mxu0 %vm212_vm1, %v508_v63  ;;  %2603 = vmatpush3.bf16.msra.mxu0 %v2602_v46 }
 0x3eb   :  { %2604 = vmatprep.subr.bf16.mxu0 %v2892_v4 }
 0x3ed   :  { %2355 = vmatmul.mubr.msk.f32.gmra.mrb[6].mxu0 %vm212_vm1, %v507_v58 }
 0x3ee   :  { %2398 = vmatprep.mubr.msk.f32.mxu0 %vm2893_vm12, %v2890_v0  ;;  %2606 = vmatpush3.bf16.msra.mxu0 %v2605_v48 }
 0x3ef   :  { %2607 = vmatprep.subr.bf16.mxu0 %v2892_v4 }
 0x3f2   :  { %2609 = vmatpush3.bf16.msra.mxu0 %v2608_v51 }
 0x3f3   :  { %2610 = vmatprep.subr.bf16.mxu0 %v2892_v4 }
 0x3f6   :  { %2612 = vmatpush3.bf16.msra.mxu0 %v2611_v54 }
 0x3f7   :  { %2625 = vmatprep.subr.bf16.mxu0 %v2892_v4 }
 0x4bc   :  { %v2353_v15 = vpop.f32.mrb[4].mxu0 }
 0x4bd   :  { %v598_v16 = vadd.f32 %v2353_v15, %v2126_v14  ;;  %v592_v17 = vpop.f32.mrb[5].mxu0 }
 0x4be   :  { %v593_v18 = vadd.f32 %v2126_v14, %v592_v17 }
 0x4bf   :  { %613 = vst.msk [vmem:[#allocation2 + $0x38] sm:$0x1f] %vm612_vm10, %v598_v16  ;;  %vm1186_vm10 = vcmask 261121  }
 0x4c0   :  { %615 = vst.msk [vmem:[#allocation2 + $0xcb] sm:$0xe0] %vm614_vm11, %v598_v16  ;;  %v2356_v19 = vpop.f32.mrb[6].mxu0  ;;  %vm1242_vm11 = vcmask 785408  }
 0x4c1   :  { %611 = vst.msk [vmem:[#allocation2 + $0x30] sm:$0xff] %vm45_vm0, %v593_v18  ;;  %v608_v20 = vadd.f32 %v2356_v19, %v2126_v14  ;;  %v602_v21 = vpop.f32.mrb[7].mxu0 }
 0x4c2   :  { %v603_v22 = vadd.f32 %v2126_v14, %v602_v21 }
 0x4c3   :  { %618 = vst.msk [vmem:[#allocation2 + $0xdb] sm:$0x3] %vm617_vm13, %v608_v20 }
 0x4c4   :  { %616 = vst.msk [vmem:[#allocation2 + $0xd3] sm:$0xff] %vm45_vm0, %v603_v22 }
 0x4c6   :  { %v630_v25 = vld [vmem:[#allocation2 + $0x39] sm:$0xf] }
 0x4c7   :  { %v628_v35 = vld [vmem:[#allocation2 + $0x38] sm:$0xf] }
 0x4c8   :  { %v629_v23 = vld [vmem:[#allocation2 + $0x31] sm:$0xff] }
 0x4c9   :  { %633 = vrot.lane.b32.xlu1 %v629_v23, %s2891_s0  ;;  %v627_v28 = vld [vmem:[#allocation2 + $0x30] sm:$0xff]  ;;  %v904_v23 = vld [vmem:[#allocation3 + $0x140] sm:$0xff] }
 0x4cb   :  { %v643_v24 = vld [vmem:[#allocation2 + $0xd1] sm:$0xff]  ;;  %v644_v26 = vld [vmem:[#allocation2 + $0xd9] sm:$0xf] }
 0x4cc   :  { %647 = vrot.lane.b32.xlu0 %v643_v24, %s2891_s0  ;;  %v641_v31 = vld [vmem:[#allocation2 + $0xd0] sm:$0xff]  ;;  %v642_v38 = vld [vmem:[#allocation2 + $0xd8] sm:$0xf]  ;;  %v905_v24 = vld [vmem:[#allocation3 + $0x148] sm:$0xff] }
 0x4cd   :  { %635 = vrot.lane.b32.xlu1 %v630_v25, %s2891_s0  ;;  %v906_v25 = vld [vmem:[#allocation3 + $0x150] sm:$0xff] }
 0x4d0   :  { %649 = vrot.lane.b32.xlu0 %v644_v26, %s2891_s0  ;;  %v2614_v26 = vpack.c.bf16 %v905_v24, %v904_v23 }
 0x53b   :  { %v634_v27 = vpop.permute.xlu1 %633 }
 0x53c   :  { %v639_v29 = vsel %vm45_vm0, %v627_v28, %v634_v27  ;;  %v907_v27 = vld [vmem:[#allocation3 + $0x158] sm:$0xff] }
 0x53d   :  { %2374 = vmatmul.mubr.msk.f32.vlgmr.msra.gmra.mrb[4].mxu1 %vm212_vm1, %v639_v29  ;;  %v2617_v28 = vpack.c.bf16 %v907_v27, %v906_v25  ;;  %v908_v29 = vld [vmem:[#allocation3 + $0x160] sm:$0xff] }
 0x53e   :  { %2376 = vmatprep.mubr.msk.f32.mxu1 %vm2893_vm12, %v2890_v0  ;;  %v648_v30 = vpop.permute.xlu0 %647  ;;  %2615 = vmatpush3.bf16.msra.mxu1 %v2614_v26 }
 0x53f   :  { %v636_v32 = vpop.permute.xlu1 %635  ;;  %v653_v33 = vsel %vm45_vm0, %v641_v31, %v648_v30  ;;  %2616 = vmatprep.subr.bf16.mxu1 %v2892_v4  ;;  %v909_v30 = vld [vmem:[#allocation3 + $0x168] sm:$0xff] }
 0x540   :  { %v658_v34 = vrot.slane %v653_v33, 4  ;;  %v640_v36 = vsel %vm45_vm0, %v628_v35, %v636_v32  ;;  %v2620_v31 = vpack.c.bf16 %v909_v30, %v908_v29  ;;  %v910_v32 = vld [vmem:[#allocation3 + $0x170] sm:$0xff]  ;;  %v911_v33 = vld [vmem:[#allocation3 + $0x178] sm:$0xff]  ;;  %v2135_v35 = vld [vmem:[%s3374_s2 + $0x4] ss:$0 sm:$0xff] }
 0x542   :  { %v650_v37 = vpop.permute.xlu0 %649  ;;  %v662_v39 = vsel %vm657_vm14, %v640_v36, %v658_v34  ;;  %2618 = vmatpush3.bf16.msra.mxu1 %v2617_v28 }
 0x543   :  { %v654_v40 = vsel %vm45_vm0, %v642_v38, %v650_v37  ;;  %2377 = vmatmul.mubr.msk.f32.gmra.mrb[6].mxu1 %vm212_vm1, %v662_v39  ;;  %2619 = vmatprep.subr.bf16.mxu1 %v2892_v4 }
 0x544   :  { %v659_v41 = vrot.slane %v654_v40, 4  ;;  %2379 = vmatprep.mubr.msk.f32.mxu1 %vm2893_vm12, %v2890_v0 }
 0x546   :  { %v660_v42 = vsel %vm657_vm14, %v658_v34, %v659_v41  ;;  %2621 = vmatpush3.bf16.msra.mxu1 %v2620_v31  ;;  %v2623_v34 = vpack.c.bf16 %v911_v33, %v910_v32 }
 0x547   :  { %2380 = vmatmul.mubr.msk.f32.gmra.mrb[8].mxu1 %vm212_vm1, %v660_v42  ;;  %2622 = vmatprep.subr.bf16.mxu1 %v2892_v4 }
 0x548   :  { %2423 = vmatprep.mubr.msk.f32.mxu1 %vm2893_vm12, %v2890_v0 }
 0x54a   :  { %2624 = vmatpush3.bf16.msra.mxu1 %v2623_v34 }
 0x54b   :  { %2637 = vmatprep.subr.bf16.mxu1 %v2892_v4 }
 0x610   :  { %v742_v56 = vpop.f32.mrb[4].mxu1 }
 0x611   :  { %v743_v57 = vadd.f32 %v2131_v55, %v742_v56  ;;  %v2375_v58 = vpop.f32.mrb[5].mxu1 }
 0x613   :  { %756 = vst.msk [vmem:[#allocation2 + $0x40] sm:$0xff] %vm45_vm0, %v743_v57 }
 0x616   :  { %v747_v59 = vpop.f32.mrb[6].mxu1 }
 0x617   :  { %v748_v60 = vadd.f32 %v2131_v55, %v747_v59  ;;  %v2378_v61 = vpop.f32.mrb[7].mxu1 }
 0x619   :  { %757 = vst.msk [vmem:[#allocation2 + $0x48] sm:$0xf] %vm465_vm8, %v748_v60 }
 0x61a   :  { %759 = vst.msk [vmem:[#allocation2 + $0xdc] sm:$0xf0] %vm758_vm15, %v748_v60  ;;  %v752_v62 = vpop.f32.mrb[8].mxu1  ;;  %v3151_v7 = vld [vmem:[#allocation2 + $0x40] sm:$0xff] }
 0x61b   :  { %v753_v63 = vadd.f32 %v2131_v55, %v752_v62  ;;  %v2381_v1 = vpop.f32.mrb[9].mxu1 }
 0x61d   :  { %760 = vst.msk [vmem:[#allocation2 + $0xe4] sm:$0xff] %vm45_vm0, %v753_v63 }
 0x620   :  { %v771_v2 = vld [vmem:[#allocation2 + $0x41] sm:$0xff]  ;;  %v772_v3 = vld [vmem:[#allocation2 + $0x49] sm:$0x7] }
 0x621   :  { %775 = vrot.lane.b32.xlu1 %v771_v2, %s2891_s0  ;;  %v770_v14 = vld [vmem:[#allocation2 + $0x48] sm:$0x7]  ;;  %v1046_v2 = vld [vmem:[#allocation3 + $0x180] sm:$0xff] }
 0x624   :  { %v785_v5 = vld [vmem:[#allocation2 + $0xe1] sm:$0xff]  ;;  %v786_v6 = vld [vmem:[#allocation2 + $0xe9] sm:$0x7] }
 0x625   :  { %777 = vrot.lane.b32.xlu1 %v772_v3, %s2891_s0  ;;  %789 = vrot.lane.b32.xlu0 %v785_v5, %s2891_s0  ;;  %v3158_v12 = vld [vmem:[#allocation2 + $0xe0] sm:$0xff]  ;;  %v784_v18 = vld [vmem:[#allocation2 + $0xe8] sm:$0x7]  ;;  %v1048_v5 = vld [vmem:[#allocation3 + $0x190] sm:$0xff] }
 0x626   :  { %v1047_v3 = vld [vmem:[#allocation3 + $0x188] sm:$0xff] }
 0x629   :  { %791 = vrot.lane.b32.xlu0 %v786_v6, %s2891_s0  ;;  %v2626_v6 = vpack.c.bf16 %v1047_v3, %v1046_v2  ;;  %v1197_v3 = vld [vmem:[#allocation3 + $0x200] sm:$0xff] }
 0x693   :  { %v776_v8 = vpop.permute.xlu1 %775 }
 0x694   :  { %v781_v9 = vsel %vm45_vm0, %v3151_v7, %v776_v8  ;;  %v1049_v8 = vld [vmem:[#allocation3 + $0x198] sm:$0xff] }
 0x695   :  { %2399 = vmatmul.mubr.msk.f32.vlgmr.msra.gmra.mrb[8].mxu0 %vm212_vm1, %v781_v9  ;;  %v2629_v9 = vpack.c.bf16 %v1049_v8, %v1048_v5  ;;  %v1198_v5 = vld [vmem:[#allocation3 + $0x208] sm:$0xff] }
 0x696   :  { %2401 = vmatprep.mubr.msk.f32.mxu0 %vm2893_vm12, %v2890_v0  ;;  %2627 = vmatpush3.bf16.msra.mxu0 %v2626_v6 }
 0x697   :  { %v778_v10 = vpop.permute.xlu1 %777  ;;  %v790_v11 = vpop.permute.xlu0 %789  ;;  %2628 = vmatprep.subr.bf16.mxu0 %v2892_v4 }
 0x698   :  { %v795_v13 = vsel %vm45_vm0, %v3158_v12, %v790_v11  ;;  %v782_v16 = vsel %vm45_vm0, %v770_v14, %v778_v10  ;;  %v1050_v10 = vld [vmem:[#allocation3 + $0x1a0] sm:$0xff]  ;;  %v1051_v11 = vld [vmem:[#allocation3 + $0x1a8] sm:$0xff]  ;;  %v1052_v14 = vld [vmem:[#allocation3 + $0x1b0] sm:$0xff] }
 0x699   :  { %v800_v15 = vrot.slane %v795_v13, 5  ;;  %v2632_v13 = vpack.c.bf16 %v1051_v11, %v1050_v10  ;;  %v1199_v11 = vld [vmem:[#allocation3 + $0x210] sm:$0xff] }
 0x69a   :  { %2630 = vmatpush3.bf16.msra.mxu0 %v2629_v9  ;;  %v2650_v9 = vpack.c.bf16 %v1198_v5, %v1197_v3  ;;  %v1428_v5 = vld [vmem:[#allocation3 + $0x278] sm:$0xff] }
 0x69b   :  { %v792_v17 = vpop.permute.xlu0 %791  ;;  %v804_v19 = vsel %vm799_vm2, %v782_v16, %v800_v15  ;;  %2631 = vmatprep.subr.bf16.mxu0 %v2892_v4 }
 0x69c   :  { %v796_v20 = vsel %vm45_vm0, %v784_v18, %v792_v17  ;;  %2402 = vmatmul.mubr.msk.f32.gmra.mrb[10].mxu0 %vm212_vm1, %v804_v19  ;;  %v2139_v17 = vld [vmem:[%s3374_s2 + $0x5] ss:$0 sm:$0xff] }
 0x69d   :  { %v801_v21 = vrot.slane %v796_v20, 5  ;;  %2404 = vmatprep.mubr.msk.f32.mxu0 %vm2893_vm12, %v2890_v0 }
 0x69e   :  { %2633 = vmatpush3.bf16.msra.mxu0 %v2632_v13  ;;  %v1200_v13 = vld [vmem:[#allocation3 + $0x218] sm:$0xff] }
 0x69f   :  { %v802_v22 = vsel %vm799_vm2, %v800_v15, %v801_v21  ;;  %v1053_v15 = vld [vmem:[#allocation3 + $0x1b8] sm:$0xff]  ;;  %2634 = vmatprep.subr.bf16.mxu0 %v2892_v4 }
 0x6a0   :  { %2405 = vmatmul.mubr.msk.f32.gmra.mrb[12].mxu0 %vm212_vm1, %v802_v22  ;;  %v2635_v16 = vpack.c.bf16 %v1053_v15, %v1052_v14 }
 0x6a1   :  { %2448 = vmatprep.mubr.msk.f32.mxu0 %vm2893_vm12, %v2890_v0 }
 0x6a2   :  { %2636 = vmatpush3.bf16.msra.mxu0 %v2635_v16  ;;  %v2653_v16 = vpack.c.bf16 %v1200_v13, %v1199_v11  ;;  %v1431_v11 = vld [vmem:[#allocation3 + $0x290] sm:$0xff]  ;;  %v2149_v13 = vld [vmem:[%s3374_s2 + $0x8] ss:$0 sm:$0xff] }
 0x6a3   :  { %2655 = vmatprep.subr.bf16.mxu0 %v2892_v4 }
 0x768   :  { %v884_v36 = vpop.f32.mrb[8].mxu0 }
 0x769   :  { %v885_v37 = vadd.f32 %v2135_v35, %v884_v36  ;;  %v2400_v38 = vpop.f32.mrb[9].mxu0 }
 0x76b   :  { %898 = vst.msk [vmem:[#allocation2 + $0x50] sm:$0xff] %vm45_vm0, %v885_v37 }
 0x76f   :  { %v889_v39 = vpop.f32.mrb[10].mxu0 }
 0x770   :  { %v890_v40 = vadd.f32 %v2135_v35, %v889_v39  ;;  %v2403_v41 = vpop.f32.mrb[11].mxu0 }
 0x772   :  { %900 = vst.msk [vmem:[#allocation2 + $0x58] sm:$0x7] %vm899_vm3, %v890_v40  ;;  %v3186_v49 = vld [vmem:[#allocation2 + $0x50] sm:$0xff] }
 0x773   :  { %902 = vst.msk [vmem:[#allocation2 + $0xed] sm:$0xf8] %vm901_vm4, %v890_v40  ;;  %v894_v42 = vpop.f32.mrb[12].mxu0 }
 0x774   :  { %v895_v43 = vadd.f32 %v2135_v35, %v894_v42  ;;  %v2406_v44 = vpop.f32.mrb[13].mxu0 }
 0x776   :  { %903 = vst.msk [vmem:[#allocation2 + $0xf5] sm:$0x3f] %vm314_vm5, %v895_v43  ;;  %vm942_vm5 = vcmask 1041408  }
 0x779   :  { %v914_v45 = vld [vmem:[#allocation2 + $0x51] sm:$0xff]  ;;  %v915_v46 = vld [vmem:[#allocation2 + $0x59] sm:$0x3] }
 0x77a   :  { %918 = vrot.lane.b32.xlu1 %v914_v45, %s2891_s0  ;;  %v913_v56 = vld [vmem:[#allocation2 + $0x58] sm:$0x3] }
 0x77d   :  { %v928_v47 = vld [vmem:[#allocation2 + $0xf1] sm:$0xff]  ;;  %v929_v48 = vld [vmem:[#allocation2 + $0xf9] sm:$0x3] }
 0x77e   :  { %920 = vrot.lane.b32.xlu1 %v915_v46, %s2891_s0  ;;  %932 = vrot.lane.b32.xlu0 %v928_v47, %s2891_s0  ;;  %v3193_v54 = vld [vmem:[#allocation2 + $0xf0] sm:$0xff]  ;;  %v927_v60 = vld [vmem:[#allocation2 + $0xf8] sm:$0x3]  ;;  %v1189_v47 = vld [vmem:[#allocation3 + $0x1c0] sm:$0xff] }
 0x782   :  { %934 = vrot.lane.b32.xlu0 %v929_v48, %s2891_s0  ;;  %v1190_v48 = vld [vmem:[#allocation3 + $0x1c8] sm:$0xff] }
 0x7ec   :  { %v919_v50 = vpop.permute.xlu1 %918 }
 0x7ed   :  { %v924_v51 = vsel %vm45_vm0, %v3186_v49, %v919_v50  ;;  %v1191_v50 = vld [vmem:[#allocation3 + $0x1d0] sm:$0xff] }
 0x7ee   :  { %2424 = vmatmul.mubr.msk.f32.vlgmr.msra.gmra.mrb[10].mxu1 %vm212_vm1, %v924_v51  ;;  %v2638_v51 = vpack.c.bf16 %v1190_v48, %v1189_v47 }
 0x7ef   :  { %2426 = vmatprep.mubr.msk.f32.mxu1 %vm2893_vm12, %v2890_v0 }
 0x7f0   :  { %v921_v52 = vpop.permute.xlu1 %920  ;;  %v933_v53 = vpop.permute.xlu0 %932  ;;  %2639 = vmatpush3.bf16.msra.mxu1 %v2638_v51 }
 0x7f1   :  { %v938_v55 = vsel %vm45_vm0, %v3193_v54, %v933_v53  ;;  %v925_v58 = vsel %vm45_vm0, %v913_v56, %v921_v52  ;;  %v1192_v52 = vld [vmem:[#allocation3 + $0x1d8] sm:$0xff]  ;;  %2640 = vmatprep.subr.bf16.mxu1 %v2892_v4  ;;  %v1194_v56 = vld [vmem:[#allocation3 + $0x1e8] sm:$0xff] }
 0x7f2   :  { %v943_v57 = vrot.slane %v938_v55, 6  ;;  %v2641_v53 = vpack.c.bf16 %v1192_v52, %v1191_v50  ;;  %v1193_v55 = vld [vmem:[#allocation3 + $0x1e0] sm:$0xff] }
 0x7f4   :  { %v935_v59 = vpop.permute.xlu0 %934  ;;  %v947_v61 = vsel %vm942_vm5, %v925_v58, %v943_v57  ;;  %2642 = vmatpush3.bf16.msra.mxu1 %v2641_v53  ;;  %v1195_v58 = vld [vmem:[#allocation3 + $0x1f0] sm:$0xff] }
 0x7f5   :  { %v939_v62 = vsel %vm45_vm0, %v927_v60, %v935_v59  ;;  %2427 = vmatmul.mubr.msk.f32.gmra.mrb[12].mxu1 %vm212_vm1, %v947_v61  ;;  %2643 = vmatprep.subr.bf16.mxu1 %v2892_v4  ;;  %v1196_v59 = vld [vmem:[#allocation3 + $0x1f8] sm:$0xff]  ;;  %v2143_v61 = vld [vmem:[%s3374_s2 + $0x6] ss:$0 sm:$0xff] }
 0x7f6   :  { %v944_v63 = vrot.slane %v939_v62, 6  ;;  %2429 = vmatprep.mubr.msk.f32.mxu1 %vm2893_vm12, %v2890_v0  ;;  %v2647_v60 = vpack.c.bf16 %v1196_v59, %v1195_v58 }
 0x7f8   :  { %v945_v1 = vsel %vm942_vm5, %v943_v57, %v944_v63  ;;  %v2644_v57 = vpack.c.bf16 %v1194_v56, %v1193_v55 }
 0x7f9   :  { %2430 = vmatmul.mubr.msk.f32.gmra.mrb[14].mxu1 %vm212_vm1, %v945_v1 }
 0x7fa   :  { %2481 = vmatprep.mubr.msk.f32.mxu1 %vm2893_vm12, %v2890_v0  ;;  %2645 = vmatpush3.bf16.msra.mxu1 %v2644_v57 }
 0x7fb   :  { %2646 = vmatprep.subr.bf16.mxu1 %v2892_v4 }
 0x7fe   :  { %2648 = vmatpush3.bf16.msra.mxu1 %v2647_v60 }
 0x7ff   :  { %2649 = vmatprep.subr.bf16.mxu1 %v2892_v4 }
 0x802   :  { %2651 = vmatpush3.bf16.msra.mxu1 %v2650_v9  ;;  %v1430_v9 = vld [vmem:[#allocation3 + $0x288] sm:$0xff] }
 0x803   :  { %2652 = vmatprep.subr.bf16.mxu1 %v2892_v4 }
 0x806   :  { %2654 = vmatpush3.bf16.msra.mxu1 %v2653_v16 }
 0x807   :  { %2667 = vmatprep.subr.bf16.mxu1 %v2892_v4 }
 0x8c1   :  { %v1027_v18 = vpop.f32.mrb[10].mxu1 }
 0x8c2   :  { %v1028_v19 = vadd.f32 %v2139_v17, %v1027_v18  ;;  %v2425_v20 = vpop.f32.mrb[11].mxu1 }
 0x8c4   :  { %1041 = vst.msk [vmem:[#allocation2 + $0x60] sm:$0xff] %vm45_vm0, %v1028_v19 }
 0x8c8   :  { %v1032_v21 = vpop.f32.mrb[12].mxu1 }
 0x8c9   :  { %v1033_v22 = vadd.f32 %v2139_v17, %v1032_v21  ;;  %v2428_v23 = vpop.f32.mrb[13].mxu1 }
 0x8cb   :  { %1042 = vst.msk [vmem:[#allocation2 + $0x68] sm:$0x3] %vm617_vm13, %v1033_v22  ;;  %v3221_v31 = vld [vmem:[#allocation2 + $0x60] sm:$0xff] }
 0x8cc   :  { %1044 = vst.msk [vmem:[#allocation2 + $0xfe] sm:$0xfc] %vm1043_vm6, %v1033_v22  ;;  %v1037_v24 = vpop.f32.mrb[14].mxu1 }
 0x8cd   :  { %v1038_v25 = vadd.f32 %v2139_v17, %v1037_v24  ;;  %v2431_v26 = vpop.f32.mrb[15].mxu1 }
 0x8cf   :  { %1045 = vst.msk [vmem:[#allocation2 + $0x106] sm:$0xf] %vm465_vm8, %v1038_v25 }
 0x8d2   :  { %v1056_v27 = vld [vmem:[#allocation2 + $0x61] sm:$0xff]  ;;  %v1057_v28 = vld [vmem:[#allocation2 + $0x69] sm:$0x1] }
 0x8d3   :  { %1060 = vrot.lane.b32.xlu1 %v1056_v27, %s2891_s0  ;;  %v1055_v38 = vld [vmem:[#allocation2 + $0x68] sm:$0x1] }
 0x8d6   :  { %v1070_v29 = vld [vmem:[#allocation2 + $0x101] sm:$0xff]  ;;  %v1071_v30 = vld [vmem:[#allocation2 + $0x109] sm:$0x1] }
 0x8d7   :  { %1062 = vrot.lane.b32.xlu1 %v1057_v28, %s2891_s0  ;;  %1074 = vrot.lane.b32.xlu0 %v1070_v29, %s2891_s0  ;;  %v3228_v36 = vld [vmem:[#allocation2 + $0x100] sm:$0xff]  ;;  %v1069_v42 = vld [vmem:[#allocation2 + $0x108] sm:$0x1] }
 0x8db   :  { %1076 = vrot.lane.b32.xlu0 %v1071_v30, %s2891_s0 }
 0x945   :  { %v1061_v32 = vpop.permute.xlu1 %1060 }
 0x946   :  { %v1066_v33 = vsel %vm45_vm0, %v3221_v31, %v1061_v32 }
 0x947   :  { %2449 = vmatmul.mubr.msk.f32.vlgmr.msra.gmra.mrb[14].mxu0 %vm212_vm1, %v1066_v33 }
 0x948   :  { %2451 = vmatprep.mubr.msk.f32.mxu0 %vm2893_vm12, %v2890_v0 }
 0x949   :  { %v1063_v34 = vpop.permute.xlu1 %1062  ;;  %v1075_v35 = vpop.permute.xlu0 %1074 }
 0x94a   :  { %v1080_v37 = vsel %vm45_vm0, %v3228_v36, %v1075_v35  ;;  %v1067_v40 = vsel %vm45_vm0, %v1055_v38, %v1063_v34  ;;  %v1318_v34 = vld [vmem:[#allocation3 + $0x220] sm:$0xff]  ;;  %v1319_v35 = vld [vmem:[#allocation3 + $0x228] sm:$0xff] }
 0x94b   :  { %v1085_v39 = vrot.slane %v1080_v37, 7  ;;  %v1320_v37 = vld [vmem:[#allocation3 + $0x230] sm:$0xff]  ;;  %v2656_v38 = vpack.c.bf16 %v1319_v35, %v1318_v34  ;;  %v1536_v35 = vld [vmem:[#allocation3 + $0x2c0] sm:$0xff] }
 0x94d   :  { %v1077_v41 = vpop.permute.xlu0 %1076  ;;  %v1089_v43 = vsel %vm1084_vm7, %v1067_v40, %v1085_v39  ;;  %2657 = vmatpush3.bf16.msra.mxu0 %v2656_v38 }
 0x94e   :  { %v1081_v44 = vsel %vm45_vm0, %v1069_v42, %v1077_v41  ;;  %2452 = vmatmul.mubr.msk.f32.gmra.mrb[16].mxu0 %vm212_vm1, %v1089_v43  ;;  %2658 = vmatprep.subr.bf16.mxu0 %v2892_v4  ;;  %v1322_v41 = vld [vmem:[#allocation3 + $0x240] sm:$0xff]  ;;  %v1323_v42 = vld [vmem:[#allocation3 + $0x248] sm:$0xff] }
 0x94f   :  { %v1086_v45 = vrot.slane %v1081_v44, 7  ;;  %2454 = vmatprep.mubr.msk.f32.mxu0 %vm2893_vm12, %v2890_v0  ;;  %v2662_v43 = vpack.c.bf16 %v1323_v42, %v1322_v41  ;;  %v1324_v44 = vld [vmem:[#allocation3 + $0x250] sm:$0xff]  ;;  %v2151_v41 = vld [vmem:[%s3374_s2 + $0x9] ss:$0 sm:$0xff] }
 0x951   :  { %v1087_v46 = vsel %vm1084_vm7, %v1085_v39, %v1086_v45  ;;  %v1321_v39 = vld [vmem:[#allocation3 + $0x238] sm:$0xff] }
 0x952   :  { %2455 = vmatmul.mubr.msk.f32.gmra.mrb[18].mxu0 %vm212_vm1, %v1087_v46  ;;  %v2659_v40 = vpack.c.bf16 %v1321_v39, %v1320_v37  ;;  %v1325_v45 = vld [vmem:[#allocation3 + $0x258] sm:$0xff]  ;;  %v2147_v46 = vld [vmem:[%s3374_s2 + $0x7] ss:$0 sm:$0xff]  ;;  %v1537_v37 = vld [vmem:[#allocation3 + $0x2c8] sm:$0xff] }
 0x953   :  { %2500 = vmatprep.mubr.msk.f32.mxu0 %vm2893_vm12, %v2890_v0  ;;  %v2665_v47 = vpack.c.bf16 %v1325_v45, %v1324_v44  ;;  %v2686_v38 = vpack.c.bf16 %v1537_v37, %v1536_v35  ;;  %v1538_v39 = vld [vmem:[#allocation3 + $0x2d0] sm:$0xff]  ;;  %v1743_v37 = vld [vmem:[#allocation5 + $0xa0] sm:$0xff] }
 0x954   :  { %2660 = vmatpush3.bf16.msra.mxu0 %v2659_v40  ;;  %v1539_v40 = vld [vmem:[#allocation3 + $0x2d8] sm:$0xff] }
 0x955   :  { %2661 = vmatprep.subr.bf16.mxu0 %v2892_v4  ;;  %v2689_v42 = vpack.c.bf16 %v1539_v40, %v1538_v39  ;;  %v2153_v40 = vld [vmem:[%s3374_s2 + $0xa] ss:$0 sm:$0xff] }
 0x958   :  { %2663 = vmatpush3.bf16.msra.mxu0 %v2662_v43 }
 0x959   :  { %2664 = vmatprep.subr.bf16.mxu0 %v2892_v4 }
 0x95c   :  { %2666 = vmatpush3.bf16.msra.mxu0 %v2665_v47 }
 0x95d   :  { %2679 = vmatprep.subr.bf16.mxu0 %v2892_v4 }
 0xa1a   :  { %v1169_v62 = vpop.f32.mrb[14].mxu0 }
 0xa1b   :  { %v1170_v63 = vadd.f32 %v2143_v61, %v1169_v62  ;;  %v2450_v1 = vpop.f32.mrb[15].mxu0 }
 0xa1c   :  { %v1426_v1 = vld [vmem:[#allocation3 + $0x268] sm:$0xff] }
 0xa1d   :  { %1183 = vst.msk [vmem:[#allocation2 + $0x70] sm:$0xff] %vm45_vm0, %v1170_v63  ;;  %v1425_v63 = vld [vmem:[#allocation3 + $0x260] sm:$0xff] }
 0xa1e   :  { %v2668_v3 = vpack.c.bf16 %v1426_v1, %v1425_v63  ;;  %v1724_v63 = vld [vmem:[#allocation5 + $0x8] sm:$0xff]  ;;  %v1726_v1 = vld [vmem:[#allocation5 + $0x18] sm:$0xff] }
 0xa21   :  { %v1174_v2 = vpop.f32.mrb[16].mxu0 }
 0xa22   :  { %v1175_v6 = vadd.f32 %v2143_v61, %v1174_v2  ;;  %v2453_v8 = vpop.f32.mrb[17].mxu0  ;;  %v1427_v2 = vld [vmem:[#allocation3 + $0x270] sm:$0xff] }
 0xa23   :  { %v1429_v8 = vld [vmem:[#allocation3 + $0x280] sm:$0xff] }
 0xa24   :  { %1185 = vst.msk [vmem:[#allocation2 + $0x78] sm:$0x1] %vm1184_vm9, %v1175_v6  ;;  %v1204_v20 = vld [vmem:[#allocation2 + $0x71] ss:$2 sm:$0xf] }
 0xa25   :  { %1187 = vst.msk [vmem:[#allocation2 + $0x10f] sm:$0xfe] %vm1186_vm10, %v1175_v6  ;;  %v1179_v10 = vpop.f32.mrb[18].mxu0  ;;  %v1202_v27 = vld [vmem:[#allocation2 + $0x70] ss:$2 sm:$0xf]  ;;  %v2671_v6 = vpack.c.bf16 %v1428_v5, %v1427_v2 }
 0xa26   :  { %v1180_v14 = vadd.f32 %v2143_v61, %v1179_v10  ;;  %v2456_v15 = vpop.f32.mrb[19].mxu0  ;;  %v2674_v10 = vpack.c.bf16 %v1430_v9, %v1429_v8  ;;  %v1723_v2 = vld [vmem:[#allocation5] sm:$0xff]  ;;  %v1725_v5 = vld [vmem:[#allocation5 + $0x10] sm:$0xff]  ;;  %v1730_v8 = vld [vmem:[#allocation5 + $0x38] sm:$0xff] }
 0xa27   :  { %v2693_v9 = vpack.c.bf16 %v1725_v5, %v1723_v2  ;;  %v1760_v5 = vld [vmem:[#allocation5 + $0x128] sm:$0xff] }
 0xa28   :  { %1188 = vst.msk [vmem:[#allocation2 + $0x117] sm:$0x3] %vm617_vm13, %v1180_v14 }
 0xa2b   :  { %v1206_v19 = vld [vmem:[#allocation2 + $0x72] ss:$2 sm:$0xf] }
 0xa2c   :  { %v1218_v22 = vld [vmem:[#allocation2 + $0x110] ss:$2 sm:$0xf] }
 0xa2f   :  { %v1222_v17 = vld [vmem:[#allocation2 + $0x112] ss:$2 sm:$0xf]  ;;  %v1220_v18 = vld [vmem:[#allocation2 + $0x111] ss:$2 sm:$0xf] }
 0xa30   :  { %1228 = vrot.lane.b32.xlu0 %v1222_v17, %s2894_s17  ;;  %1224 = vrot.lane.b32.xlu1 %v1220_v18, %s2891_s0 }
 0xa34   :  { %1212 = vrot.lane.b32.xlu0 %v1206_v19, %s2894_s17  ;;  %1208 = vrot.lane.b32.xlu1 %v1204_v20, %s2891_s0 }
 0xaa2   :  { %v1229_v21 = vpop.permute.xlu0 %1228  ;;  %v1225_v23 = vpop.permute.xlu1 %1224 }
 0xaa3   :  { %v1231_v24 = vsel %vm45_vm0, %v1218_v22, %v1225_v23 }
 0xaa4   :  { %v1232_v25 = vsel %vm212_vm1, %v1231_v24, %v1229_v21 }
 0xaa5   :  { %v1234_v29 = vrot.slane %v1232_v25, 4 }
 0xaa6   :  { %v1213_v26 = vpop.permute.xlu0 %1212  ;;  %v1209_v28 = vpop.permute.xlu1 %1208 }
 0xaa7   :  { %v1215_v30 = vsel %vm45_vm0, %v1202_v27, %v1209_v28  ;;  %v1532_v28 = vld [vmem:[#allocation3 + $0x2a0] sm:$0xff] }
 0xaa8   :  { %v1216_v32 = vsel %vm212_vm1, %v1215_v30, %v1213_v26  ;;  %v1534_v30 = vld [vmem:[#allocation3 + $0x2b0] sm:$0xff] }
 0xaa9   :  { %v1236_v33 = vsel %vm657_vm14, %v1216_v32, %v1234_v29  ;;  %v1533_v29 = vld [vmem:[#allocation3 + $0x2a8] sm:$0xff] }
 0xaaa   :  { %2482 = vmatmul.mubr.msk.f32.vlgmr.msra.gmra.mrb[16].mxu1 %vm1242_vm11, %v1236_v33  ;;  %v2680_v32 = vpack.c.bf16 %v1533_v29, %v1532_v28  ;;  %v1535_v33 = vld [vmem:[#allocation3 + $0x2b8] sm:$0xff]  ;;  %v1739_v29 = vld [vmem:[#allocation5 + $0x80] sm:$0xff] }
 0xaab   :  { %2519 = vmatprep.mubr.msk.f32.mxu1 %vm2893_vm12, %v2890_v0  ;;  %2669 = vmatpush3.bf16.msra.mxu1 %v2668_v3  ;;  %v2683_v34 = vpack.c.bf16 %v1535_v33, %v1534_v30  ;;  %v2691_v3 = vpack.c.bf16 %v1726_v1, %v1724_v63  ;;  %v1741_v30 = vld [vmem:[#allocation5 + $0x90] sm:$0xff]  ;;  %v1746_v33 = vld [vmem:[#allocation5 + $0xb8] sm:$0xff] }
 0xaac   :  { %2670 = vmatprep.subr.bf16.mxu1 %v2892_v4 }
 0xaaf   :  { %2672 = vmatpush3.bf16.msra.mxu1 %v2671_v6  ;;  %v1728_v6 = vld [vmem:[#allocation5 + $0x28] sm:$0xff] }
 0xab0   :  { %2673 = vmatprep.subr.bf16.mxu1 %v2892_v4 }
 0xab3   :  { %2675 = vmatpush3.bf16.msra.mxu1 %v2674_v10  ;;  %v2695_v10 = vpack.c.bf16 %v1730_v8, %v1728_v6  ;;  %v1762_v6 = vld [vmem:[#allocation5 + $0x138] sm:$0xff]  ;;  %v1759_v8 = vld [vmem:[#allocation5 + $0x120] sm:$0xff] }
 0xab4   :  { %2676 = vmatprep.subr.bf16.mxu1 %v2892_v4 }
 0xb7d   :  { %v1312_v48 = vpop.f32.mrb[16].mxu1 }
 0xb7e   :  { %v1313_v50 = vadd.f32 %v2147_v46, %v1312_v48  ;;  %v2483_v51 = vpop.f32.mrb[17].mxu1 }
 0xb80   :  { %1316 = vst.msk [vmem:[#allocation2 + $0x80] sm:$0xf] %vm465_vm8, %v1313_v50  ;;  %vm1423_vm8 = vcmask 259075  }
 0xb81   :  { %1317 = vst.msk [vmem:[#allocation2 + $0x11c] sm:$0xf0] %vm758_vm15, %v1313_v50 }
 0xb87   :  { %v1327_v53 = vld [vmem:[#allocation2 + $0x81] sm:$0x7] }
 0xb88   :  { %v1334_v52 = vld [vmem:[#allocation2 + $0x121] sm:$0x7]  ;;  %1329 = vrot.lane.b32.xlu0 %v1327_v53, %s2891_s0 }
 0xb89   :  { %1336 = vrot.lane.b32.xlu1 %v1334_v52, %s2891_s0  ;;  %v1333_v56 = vld [vmem:[#allocation2 + $0x120] sm:$0x7] }
 0xb8a   :  { %v1326_v60 = vld [vmem:[#allocation2 + $0x80] sm:$0x7] }
 0xb8b   :  { %v1655_v51 = vld [vmem:[#allocation2 + $0x80] sm:$0xff] }
 0xbfa   :  { %v1330_v57 = vpop.permute.xlu0 %1329 }
 0xbfb   :  { %v1337_v55 = vpop.permute.xlu1 %1336  ;;  %v1332_v61 = vsel %vm45_vm0, %v1326_v60, %v1330_v57 }
 0xbfc   :  { %v1339_v58 = vsel %vm45_vm0, %v1333_v56, %v1337_v55 }
 0xbfd   :  { %v1341_v59 = vrot.slane %v1339_v58, 5 }
 0xbff   :  { %v1343_v62 = vsel %vm799_vm2, %v1332_v61, %v1341_v59 }
 0xc00   :  { %2501 = vmatmul.mubr.msk.f32.vlgmr.msra.gmra.mrb[20].mxu0 %vm212_vm1, %v1343_v62 }
 0xc01   :  { %2538 = vmatprep.mubr.msk.f32.mxu0 %vm2893_vm12, %v2890_v0  ;;  %v1432_v0 = vld [vmem:[#allocation3 + $0x298] sm:$0xff]  ;;  %2681 = vmatpush3.bf16.msra.mxu0 %v2680_v32  ;;  %vm1530_vm12 = vcmask 257026   ;;  %v1744_v32 = vld [vmem:[#allocation5 + $0xa8] sm:$0xff] }
 0xc02   :  { %v2677_v14 = vpack.c.bf16 %v1432_v0, %v1431_v11  ;;  %2682 = vmatprep.subr.bf16.mxu0 %v2892_v4  ;;  %v1727_v11 = vld [vmem:[#allocation5 + $0x20] sm:$0xff]  ;;  %v1729_v0 = vld [vmem:[#allocation5 + $0x30] sm:$0xff]  ;;  %v2711_v35 = vpack.c.bf16 %v1746_v33, %v1744_v32  ;;  %v1879_v32 = vld [vmem:[#allocation2 + $0xd8] sm:$0xff] }
 0xc03   :  { %v1646_v33 = vld [vmem:[#allocation2 + $0x38] sm:$0xff] }
 0xc04   :  { %2678 = vmatpush3.bf16.msra.mxu1 %v2677_v14  ;;  %v1734_v14 = vld [vmem:[#allocation5 + $0x58] sm:$0xff] }
 0xc05   :  { %2684 = vmatpush3.bf16.msra.mxu0 %v2683_v34  ;;  %2692 = vmatprep.subr.bf16.mxu1 %v2691_v3  ;;  %v2709_v34 = vpack.c.bf16 %v1741_v30, %v1739_v29  ;;  %v2835_v29 = vld [vmem:[#allocation2 + $0xd0] sm:$0xff] }
 0xc06   :  { %2685 = vmatprep.subr.bf16.mxu0 %v2892_v4 }
 0xc09   :  { %2687 = vmatpush3.bf16.msra.mxu0 %v2686_v38  ;;  %v1745_v38 = vld [vmem:[#allocation5 + $0xb0] sm:$0xff] }
 0xc0a   :  { %2688 = vmatprep.subr.bf16.mxu0 %v2892_v4  ;;  %v1888_v4 = vld [vmem:[#allocation2 + $0x120] sm:$0xff]  ;;  %v2713_v39 = vpack.c.bf16 %v1745_v38, %v1743_v37  ;;  %v1881_v37 = vld [vmem:[#allocation2 + $0xe8] sm:$0xff] }
 0xc0b   :  { %v1648_v38 = vld [vmem:[#allocation2 + $0x48] sm:$0xff] }
 0xc0d   :  { %2690 = vmatpush3.bf16.msra.mxu0 %v2689_v42  ;;  %v1748_v42 = vld [vmem:[#allocation5 + $0xc8] sm:$0xff] }
 0xc0e   :  { %2732 = vmatprep.subr.bf16.mxu0 %v2691_v3  ;;  %v1872_v3 = vld [vmem:[#allocation2 + $0xa0] sm:$0xff] }
 0xcd3   :  { %v1418_v15 = vpop.f32.mrb[20].mxu0 }
 0xcd4   :  { %v1419_v16 = vadd.f32 %v2149_v13, %v1418_v15  ;;  %v2502_v17 = vpop.f32.mrb[21].mxu0  ;;  %v1732_v13 = vld [vmem:[#allocation5 + $0x48] sm:$0xff]  ;;  %v2697_v15 = vpack.c.bf16 %v1729_v0, %v1727_v11 }
 0xcd5   :  { %v1731_v17 = vld [vmem:[#allocation5 + $0x40] sm:$0xff] }
 0xcd6   :  { %1422 = vst.msk [vmem:[#allocation2 + $0x88] sm:$0x7] %vm899_vm3, %v1419_v16 }
 0xcd7   :  { %1424 = vst.msk [vmem:[#allocation2 + $0x125] sm:$0x38] %vm1423_vm8, %v1419_v16  ;;  %v2699_v16 = vpack.c.bf16 %v1734_v14, %v1732_v13  ;;  %v1640_v13 = vld [vmem:[#allocation2 + $0x8] sm:$0xff] }
 0xcd8   :  { %v1873_v14 = vld [vmem:[#allocation2 + $0xa8] sm:$0xff] }
 0xcdd   :  { %v1434_v19 = vld [vmem:[#allocation2 + $0x89] sm:$0x3] }
 0xcde   :  { %v1441_v18 = vld [vmem:[#allocation2 + $0x129] sm:$0x3]  ;;  %1436 = vrot.lane.b32.xlu0 %v1434_v19, %s2891_s0 }
 0xcdf   :  { %1443 = vrot.lane.b32.xlu1 %v1441_v18, %s2891_s0  ;;  %v1440_v21 = vld [vmem:[#allocation2 + $0x128] sm:$0x3]  ;;  %v1733_v18 = vld [vmem:[#allocation5 + $0x50] sm:$0xff] }
 0xce0   :  { %v1433_v25 = vld [vmem:[#allocation2 + $0x88] sm:$0x3] }
 0xce1   :  { %v1889_v48 = vld [vmem:[#allocation2 + $0x128] sm:$0xff] }
 0xce2   :  { %v1656_v52 = vld [vmem:[#allocation2 + $0x88] sm:$0xff] }
 0xce3   :  { %v1736_v19 = vld [vmem:[#allocation5 + $0x68] sm:$0xff] }
 0xd50   :  { %v1437_v22 = vpop.permute.xlu0 %1436 }
 0xd51   :  { %v1444_v20 = vpop.permute.xlu1 %1443  ;;  %v1439_v26 = vsel %vm45_vm0, %v1433_v25, %v1437_v22  ;;  %v1740_v25 = vld [vmem:[#allocation5 + $0x88] sm:$0xff] }
 0xd52   :  { %v1446_v23 = vsel %vm45_vm0, %v1440_v21, %v1444_v20  ;;  %v1738_v20 = vld [vmem:[#allocation5 + $0x78] sm:$0xff]  ;;  %v2701_v21 = vpack.c.bf16 %v1733_v18, %v1731_v17  ;;  %v1641_v17 = vld [vmem:[#allocation2 + $0x10] sm:$0xff] }
 0xd53   :  { %v1448_v24 = vrot.slane %v1446_v23, 6  ;;  %v2703_v22 = vpack.c.bf16 %v1738_v20, %v1736_v19  ;;  %v1735_v23 = vld [vmem:[#allocation5 + $0x60] sm:$0xff]  ;;  %v1875_v19 = vld [vmem:[#allocation2 + $0xb8] sm:$0xff] }
 0xd54   :  { %v1642_v20 = vld [vmem:[#allocation2 + $0x18] sm:$0xff] }
 0xd55   :  { %v1450_v27 = vsel %vm942_vm5, %v1439_v26, %v1448_v24  ;;  %v1737_v24 = vld [vmem:[#allocation5 + $0x70] sm:$0xff]  ;;  %v1742_v26 = vld [vmem:[#allocation5 + $0x98] sm:$0xff] }
 0xd56   :  { %2520 = vmatmul.mubr.msk.f32.vlgmr.msra.gmra.mrb[18].mxu1 %vm212_vm1, %v1450_v27  ;;  %v2705_v27 = vpack.c.bf16 %v1737_v24, %v1735_v23  ;;  %v2707_v28 = vpack.c.bf16 %v1742_v26, %v1740_v25  ;;  %v1643_v23 = vld [vmem:[#allocation2 + $0x20] sm:$0xff]  ;;  %v1877_v25 = vld [vmem:[#allocation2 + $0xc8] sm:$0xff] }
 0xd57   :  { %2694 = vmatpush1.bf16.msra.mxu1 %v2693_v9  ;;  %v1644_v26 = vld [vmem:[#allocation2 + $0x28] sm:$0xff] }
 0xd58   :  { %2696 = vmatprep.subr.bf16.mxu1 %v2695_v10 }
 0xd5b   :  { %2698 = vmatpush1.bf16.msra.mxu1 %v2697_v15 }
 0xd5c   :  { %2700 = vmatprep.subr.bf16.mxu1 %v2699_v16 }
 0xd5f   :  { %2702 = vmatpush1.bf16.msra.mxu1 %v2701_v21 }
 0xd60   :  { %2704 = vmatprep.subr.bf16.mxu1 %v2703_v22 }
 0xd63   :  { %2706 = vmatpush1.bf16.msra.mxu1 %v2705_v27 }
 0xd64   :  { %2708 = vmatprep.subr.bf16.mxu1 %v2707_v28 }
 0xd67   :  { %2710 = vmatpush1.bf16.msra.mxu1 %v2709_v34 }
 0xd68   :  { %2712 = vmatprep.subr.bf16.mxu1 %v2711_v35 }
 0xd6b   :  { %2714 = vmatpush1.bf16.msra.mxu1 %v2713_v39 }
 0xe29   :  { %v1525_v43 = vpop.f32.mrb[18].mxu1 }
 0xe2a   :  { %v1526_v44 = vadd.f32 %v2151_v41, %v1525_v43  ;;  %v2521_v45 = vpop.f32.mrb[19].mxu1  ;;  %v1750_v43 = vld [vmem:[#allocation5 + $0xd8] sm:$0xff] }
 0xe2c   :  { %1529 = vst.msk [vmem:[#allocation2 + $0x90] sm:$0x3] %vm617_vm13, %v1526_v44 }
 0xe2d   :  { %1531 = vst.msk [vmem:[#allocation2 + $0x12e] sm:$0xc] %vm1530_vm12, %v1526_v44  ;;  %v1747_v44 = vld [vmem:[#allocation5 + $0xc0] sm:$0xff] }
 0xe33   :  { %v1541_v47 = vld [vmem:[#allocation2 + $0x91] sm:$0x1]  ;;  %v1540_v60 = vld [vmem:[#allocation2 + $0x90] sm:$0x1] }
 0xe34   :  { %v1548_v46 = vld [vmem:[#allocation2 + $0x131] sm:$0x1]  ;;  %1543 = vrot.lane.b32.xlu0 %v1541_v47, %s2891_s0  ;;  %v1547_v56 = vld [vmem:[#allocation2 + $0x130] sm:$0x1]  ;;  %v2715_v47 = vpack.c.bf16 %v1750_v43, %v1748_v42  ;;  %v1650_v42 = vld [vmem:[#allocation2 + $0x58] sm:$0xff] }
 0xe35   :  { %1550 = vrot.lane.b32.xlu1 %v1548_v46, %s2891_s0  ;;  %v1890_v50 = vld [vmem:[#allocation2 + $0x130] sm:$0xff] }
 0xe36   :  { %v1657_v53 = vld [vmem:[#allocation2 + $0x90] sm:$0xff]  ;;  %2716 = vmatprep.subr.bf16.mxu1 %v2715_v47 }
 0xe52   :  { %1924 = vxpose.xlu0.b32.start [1/4] (short) (narrow) %v1888_v4, 32  ;;  %v1749_v4 = vld [vmem:[#allocation5 + $0xd0] sm:$0xff] }
 0xe56   :  { %1925 = vxpose.xlu0.b32.cont [2/4] (short) (narrow) %v1889_v48, 32  ;;  %v2717_v48 = vpack.c.bf16 %v1749_v4, %v1747_v44  ;;  %v2806_v44 = vpack.i.bf16 %v3228_v36, %v3221_v31 }
 0xe58   :  { %2718 = vmatpush1.bf16.msra.mxu1 %v2717_v48 }
 0xe5a   :  { %1926 = vxpose.xlu0.b32.cont [3/4] (short) (narrow) %v1890_v50, 32  ;;  %v1752_v50 = vld [vmem:[#allocation5 + $0xe8] sm:$0xff] }
 0xe5e   :  { %1691 = vxpose.xlu1.b32.start [1/4] (short) (narrow) %v1655_v51, 32  ;;  %v1754_v51 = vld [vmem:[#allocation5 + $0xf8] sm:$0xff] }
 0xe62   :  { %1692 = vxpose.xlu1.b32.cont [2/4] (short) (narrow) %v1656_v52, 32  ;;  %v1751_v52 = vld [vmem:[#allocation5 + $0xe0] sm:$0xff] }
 0xe66   :  { %1693 = vxpose.xlu1.b32.cont [3/4] (short) (narrow) %v1657_v53, 32  ;;  %v2719_v53 = vpack.c.bf16 %v1754_v51, %v1752_v50  ;;  %v1654_v50 = vld [vmem:[#allocation2 + $0x78] sm:$0xff] }
 0xe68   :  { %2720 = vmatprep.subr.bf16.mxu1 %v2719_v53 }
 0xea6   :  { %v1544_v57 = vpop.permute.xlu0 %1543 }
 0xea7   :  { %v1551_v55 = vpop.permute.xlu1 %1550  ;;  %v1546_v61 = vsel %vm45_vm0, %v1540_v60, %v1544_v57  ;;  %v1756_v57 = vld [vmem:[#allocation5 + $0x108] sm:$0xff] }
 0xea8   :  { %v1553_v58 = vsel %vm45_vm0, %v1547_v56, %v1551_v55  ;;  %v1753_v55 = vld [vmem:[#allocation5 + $0xf0] sm:$0xff] }
 0xea9   :  { %v1555_v59 = vrot.slane %v1553_v58, 7  ;;  %v2721_v56 = vpack.c.bf16 %v1753_v55, %v1751_v52  ;;  %v1758_v58 = vld [vmem:[#allocation5 + $0x118] sm:$0xff] }
 0xeaa   :  { %v2723_v60 = vpack.c.bf16 %v1758_v58, %v1756_v57 }
 0xeab   :  { %v1557_v62 = vsel %vm1084_vm7, %v1546_v61, %v1555_v59  ;;  %v1755_v59 = vld [vmem:[#allocation5 + $0x100] sm:$0xff]  ;;  %2722 = vmatpush1.bf16.msra.mxu1 %v2721_v56  ;;  %v1757_v61 = vld [vmem:[#allocation5 + $0x110] sm:$0xff] }
 0xeac   :  { %2539 = vmatmul.mubr.msk.f32.vlgmr.msra.gmra.mrb[22].mxu0 %vm212_vm1, %v1557_v62  ;;  %vm1637_vm1 = vcmask 254977   ;;  %v1639_v62 = vld [vmem:[#allocation2] sm:$0xff]  ;;  %v2725_v63 = vpack.c.bf16 %v1757_v61, %v1755_v59  ;;  %2724 = vmatprep.subr.bf16.mxu1 %v2723_v60 }
 0xead   :  { %2734 = vmatpush1.bf16.msra.mxu0 %v2693_v9  ;;  %v2727_v9 = vpack.c.bf16 %v1762_v6, %v1760_v5  ;;  %v2782_v11 = vpack.i.bf16 %v1872_v3, %v1639_v62 }
 0xeae   :  { %2736 = vmatprep.subr.bf16.mxu0 %v2695_v10  ;;  %v1761_v10 = vld [vmem:[#allocation5 + $0x130] sm:$0xff] }
 0xeaf   :  { %2726 = vmatpush1.bf16.msra.mxu1 %v2725_v63  ;;  %v2729_v0 = vpack.c.bf16 %v1761_v10, %v1759_v8 }
 0xeb0   :  { %2728 = vmatprep.subr.bf16.mxu1 %v2727_v9 }
 0xeb1   :  { %2738 = vmatpush1.bf16.msra.mxu0 %v2697_v15  ;;  %v2784_v15 = vpack.i.bf16 %v1873_v14, %v1640_v13 }
 0xeb2   :  { %2740 = vmatprep.subr.bf16.mxu0 %v2699_v16  ;;  %v1874_v16 = vld [vmem:[#allocation2 + $0xb0] sm:$0xff] }
 0xeb3   :  { %2730 = vmatpush1.bf16.msra.mxu1 %v2729_v0  ;;  %v2786_v18 = vpack.i.bf16 %v1874_v16, %v1641_v17 }
 0xeb5   :  { %2742 = vmatpush1.bf16.msra.mxu0 %v2701_v21  ;;  %v2788_v21 = vpack.i.bf16 %v1875_v19, %v1642_v20 }
 0xeb6   :  { %2744 = vmatprep.subr.bf16.mxu0 %v2703_v22  ;;  %v1876_v22 = vld [vmem:[#allocation2 + $0xc0] sm:$0xff] }
 0xeb7   :  { %v2790_v24 = vpack.i.bf16 %v1876_v22, %v1643_v23 }
 0xeb9   :  { %2746 = vmatpush1.bf16.msra.mxu0 %v2705_v27  ;;  %v2792_v27 = vpack.i.bf16 %v1877_v25, %v1644_v26 }
 0xeba   :  { %2748 = vmatprep.subr.bf16.mxu0 %v2707_v28  ;;  %v2834_v28 = vld [vmem:[#allocation2 + $0x30] sm:$0xff] }
 0xebb   :  { %v2794_v30 = vpack.i.bf16 %v2835_v29, %v2834_v28 }
 0xebd   :  { %2750 = vmatpush1.bf16.msra.mxu0 %v2709_v34  ;;  %v2796_v34 = vpack.i.bf16 %v1879_v32, %v1646_v33 }
 0xebe   :  { %2752 = vmatprep.subr.bf16.mxu0 %v2711_v35  ;;  %v2798_v35 = vpack.i.bf16 %v3158_v12, %v3151_v7  ;;  %v1886_v12 = vld [vmem:[#allocation2 + $0x110] sm:$0xff] }
 0xec1   :  { %2754 = vmatpush1.bf16.msra.mxu0 %v2713_v39  ;;  %v2800_v39 = vpack.i.bf16 %v1881_v37, %v1648_v38 }
 0xec2   :  { %2756 = vmatprep.subr.bf16.mxu0 %v2715_v47  ;;  %v1653_v47 = vld [vmem:[#allocation2 + $0x70] sm:$0xff] }
 0xec3   :  { %v2810_v4 = vpack.i.bf16 %v1886_v12, %v1653_v47 }
 0xec5   :  { %2758 = vmatpush1.bf16.msra.mxu0 %v2717_v48  ;;  %v1887_v48 = vld [vmem:[#allocation2 + $0x118] sm:$0xff] }
 0xec6   :  { %2760 = vmatprep.subr.bf16.mxu0 %v2719_v53 }
 0xec9   :  { %2762 = vmatpush1.bf16.msra.mxu0 %v2721_v56 }
 0xeca   :  { %2764 = vmatprep.subr.bf16.mxu0 %v2723_v60 }
 0xecd   :  { %2766 = vmatpush1.bf16.msra.mxu0 %v2725_v63 }
 0xece   :  { %2768 = vmatprep.subr.bf16.mxu0 %v2727_v9 }
 0xed1   :  { %2770 = vmatpush1.bf16.msra.mxu0 %v2729_v0 }
 0xf7f   :  { %v1632_v41 = vpop.f32.mrb[22].mxu0 }
 0xf80   :  { %v1633_v45 = vadd.f32 %v2153_v40, %v1632_v41  ;;  %v2540_v46 = vpop.f32.mrb[23].mxu0  ;;  %v2802_v40 = vpack.i.bf16 %v3193_v54, %v3186_v49  ;;  %v1883_v41 = vld [vmem:[#allocation2 + $0xf8] sm:$0xff]  ;;  %v2812_v49 = vpack.i.bf16 %v1887_v48, %v1654_v50 }
 0xf81   :  { %v2804_v43 = vpack.i.bf16 %v1883_v41, %v1650_v42  ;;  %v1652_v46 = vld [vmem:[#allocation2 + $0x68] sm:$0xff] }
 0xf82   :  { %1636 = vst.msk [vmem:[#allocation2 + $0x98] sm:$0x1] %vm1184_vm9, %v1633_v45 }
 0xf83   :  { %1638 = vst.msk [vmem:[#allocation2 + $0x137] sm:$0x2] %vm1637_vm1, %v1633_v45  ;;  %v1885_v45 = vld [vmem:[#allocation2 + $0x108] sm:$0xff] }
 0xf84   :  { %v2808_v7 = vpack.i.bf16 %v1885_v45, %v1652_v46 }
 0xf89   :  { %v1658_v2 = vld [vmem:[#allocation2 + $0x98] sm:$0xff] }
 0xf8a   :  { %v1891_v1 = vld [vmem:[#allocation2 + $0x138] sm:$0xff]  ;;  %1694 = vxpose.xlu1.b32.end [4/4] (short) (narrow) %v1658_v2, 32 }
 0xf8b   :  { %1927 = vxpose.xlu0.b32.end [4/4] (short) (narrow) %v1891_v1, 32 }
 0xf8f   :  { %2783 = vxpose.xlu0.b32.start [1/16] (narrow) %v2782_v11, 32 }
 0xf93   :  { %2785 = vxpose.xlu0.b32.cont [2/16] (narrow) %v2784_v15, 32 }
 0xf97   :  { %2787 = vxpose.xlu0.b32.cont [3/16] (narrow) %v2786_v18, 32 }
 0xf9b   :  { %2789 = vxpose.xlu0.b32.cont [4/16] (narrow) %v2788_v21, 32 }
 0xf9f   :  { %2791 = vxpose.xlu0.b32.cont [5/16] (narrow) %v2790_v24, 32 }
 0xfa3   :  { %2793 = vxpose.xlu0.b32.cont [6/16] (narrow) %v2792_v27, 32 }
 0xfa7   :  { %2795 = vxpose.xlu0.b32.cont [7/16] (narrow) %v2794_v30, 32 }
 0xfab   :  { %2797 = vxpose.xlu0.b32.cont [8/16] (narrow) %v2796_v34, 32 }
 0xfaf   :  { %2799 = vxpose.xlu0.b32.cont [9/16] (narrow) %v2798_v35, 32 }
 0xfb3   :  { %2801 = vxpose.xlu0.b32.cont [10/16] (narrow) %v2800_v39, 32 }
 0xfb7   :  { %2803 = vxpose.xlu0.b32.cont [11/16] (narrow) %v2802_v40, 32 }
 0xfbb   :  { %2805 = vxpose.xlu0.b32.cont [12/16] (narrow) %v2804_v43, 32 }
 0xfbf   :  { %2807 = vxpose.xlu0.b32.cont [13/16] (narrow) %v2806_v44, 32 }
 0xfc3   :  { %2809 = vxpose.xlu0.b32.cont [14/16] (narrow) %v2808_v7, 32 }
 0xfc7   :  { %2811 = vxpose.xlu0.b32.cont [15/16] (narrow) %v2810_v4, 32 }
 0xfcb   :  { %2813 = vxpose.xlu0.b32.end [16/16] (narrow) %v2812_v49, 32 }
 0xffe   :  { %v1707_v51 = vpop.trf.xlu1 }
 0xfff   :  { %v1940_v54 = vpop.trf.xlu0  ;;  %2155 = vmatprep.mubr.msk.f32.mxu1 %vm45_vm0, %v1707_v51 }
0x1000   :  { %2159 = vmatprep.mubr.msk.f32.mxu0 %vm45_vm0, %v1940_v54 }
0x1002   :  { %v1708_v53 = vpop.trf.xlu1 }
0x1003   :  { %v1941_v31 = vpop.trf.xlu0 }
0x1006   :  { %v1709_v58 = vpop.trf.xlu1 }
0x1007   :  { %v1942_v36 = vpop.trf.xlu0 }
0x100a   :  { %v1710_v2 = vpop.trf.xlu1 }
0x100b   :  { %v1943_v52 = vpop.trf.xlu0 }
0x100f   :  { %v2814_v55 = vpop.trf.xlu0 }
0x1010   :  { %v2818_v56 = vunpack.i.h.bf16 %v2814_v55  ;;  %v2815_v57 = vunpack.i.l.bf16 %v2814_v55 }
0x1012   :  { %1840 = vmatmul.mubr.f32.vlgmr.msra.gmra.mrb[20].mxu1 %v2815_v57  ;;  %2073 = vmatmul.mubr.f32.vlgmr.msra.gmra.mrb[24].mxu0 %v2818_v56 }
0x1013   :  { %v2819_v59 = vpop.trf.xlu0  ;;  %2160 = vmatprep.mubr.msk.f32.mxu0 %vm45_vm0, %v1941_v31  ;;  %2156 = vmatprep.mubr.msk.f32.mxu1 %vm45_vm0, %v1708_v53 }
0x1014   :  { %v2820_v60 = vunpack.i.l.bf16 %v2819_v59  ;;  %v2823_v61 = vunpack.i.h.bf16 %v2819_v59 }
0x1016   :  { %1846 = vmatmul.mubr.f32.gmra.mrb[22].mxu1 %v2820_v60  ;;  %2079 = vmatmul.mubr.f32.gmra.mrb[26].mxu0 %v2823_v61 }
0x1017   :  { %v2824_v62 = vpop.trf.xlu0  ;;  %2161 = vmatprep.mubr.msk.f32.mxu0 %vm45_vm0, %v1942_v36  ;;  %2157 = vmatprep.mubr.msk.f32.mxu1 %vm45_vm0, %v1709_v58 }
0x1018   :  { %v2825_v63 = vunpack.i.l.bf16 %v2824_v62  ;;  %v2828_v1 = vunpack.i.h.bf16 %v2824_v62 }
0x101a   :  { %1852 = vmatmul.mubr.f32.gmra.mrb[24].mxu1 %v2825_v63  ;;  %2085 = vmatmul.mubr.f32.gmra.mrb[28].mxu0 %v2828_v1 }
0x101b   :  { %v2829_v3 = vpop.trf.xlu0  ;;  %2162 = vmatprep.mubr.msk.f32.mxu0 %vm45_vm0, %v1943_v52  ;;  %2158 = vmatprep.mubr.msk.f32.mxu1 %vm45_vm0, %v1710_v2 }
0x101c   :  { %v2833_v5 = vunpack.i.h.bf16 %v2829_v3  ;;  %v2830_v6 = vunpack.i.l.bf16 %v2829_v3 }
0x101e   :  { %1858 = vmatmul.mubr.f32.gmra.mrb[26].mxu1 %v2830_v6  ;;  %2091 = vmatmul.mubr.f32.gmra.mrb[30].mxu0 %v2833_v5 }
0x10e5   :  { %v1841_v8 = vpop.f32.mrb[20].mxu1  ;;  %v2074_v9 = vpop.f32.mrb[24].mxu0 }
0x10e6   :  { %1864 = vst [vmem:[%s3376_s4] sm:$0xff] %v1841_v8  ;;  %2163 = vst [vmem:[%s3376_s4 + $0x40] sm:$0xff] %v2074_v9  ;;  %v1843_v10 = vpop.f32.mrb[21].mxu1  ;;  %v2076_v11 = vpop.f32.mrb[25].mxu0 }
0x10e7   :  { %1865 = vst [vmem:[%s3376_s4 + $0x8] sm:$0xff] %v1843_v10  ;;  %2164 = vst [vmem:[%s3376_s4 + $0x48] sm:$0xff] %v2076_v11 }
0x10e9   :  { %v1847_v0 = vpop.f32.mrb[22].mxu1  ;;  %v2080_v13 = vpop.f32.mrb[26].mxu0 }
0x10ea   :  { %1866 = vst [vmem:[%s3376_s4 + $0x10] sm:$0xff] %v1847_v0  ;;  %2165 = vst [vmem:[%s3376_s4 + $0x50] sm:$0xff] %v2080_v13  ;;  %v1849_v14 = vpop.f32.mrb[23].mxu1  ;;  %v2082_v15 = vpop.f32.mrb[27].mxu0 }
0x10eb   :  { %1867 = vst [vmem:[%s3376_s4 + $0x18] sm:$0xff] %v1849_v14  ;;  %2166 = vst [vmem:[%s3376_s4 + $0x58] sm:$0xff] %v2082_v15 }
0x10ed   :  { %v1853_v16 = vpop.f32.mrb[24].mxu1  ;;  %v2086_v17 = vpop.f32.mrb[28].mxu0 }
0x10ee   :  { %1868 = vst [vmem:[%s3376_s4 + $0x20] sm:$0xff] %v1853_v16  ;;  %2167 = vst [vmem:[%s3376_s4 + $0x60] sm:$0xff] %v2086_v17  ;;  %v1855_v18 = vpop.f32.mrb[25].mxu1  ;;  %v2088_v19 = vpop.f32.mrb[29].mxu0 }
0x10ef   :  { %1869 = vst [vmem:[%s3376_s4 + $0x28] sm:$0xff] %v1855_v18  ;;  %2168 = vst [vmem:[%s3376_s4 + $0x68] sm:$0xff] %v2088_v19 }
0x10f1   :  { %v1859_v20 = vpop.f32.mrb[26].mxu1  ;;  %v2092_v21 = vpop.f32.mrb[30].mxu0 }
0x10f2   :  { %1870 = vst [vmem:[%s3376_s4 + $0x30] sm:$0xff] %v1859_v20  ;;  %2169 = vst [vmem:[%s3376_s4 + $0x70] sm:$0xff] %v2092_v21  ;;  %v1861_v22 = vpop.f32.mrb[27].mxu1  ;;  %v2094_v23 = vpop.f32.mrb[31].mxu0 }
0x10f3   :  { %1871 = vst [vmem:[%s3376_s4 + $0x38] sm:$0xff] %v1861_v22  ;;  %2170 = vst [vmem:[%s3376_s4 + $0x78] sm:$0xff] %v2094_v23 }
0x10f4   :  { %2110 = vsyncpa [#allocation4], 1 }
0x10f5   :  { %2111 = vsyncpa [#allocation6], 1 }

</bundles_post_ra>
